<compile_context>
chip_gen: v5e
topology: v5e:2x2
jax: 0.10.0
libtpu: 0.0.40
codegen_flags: <defaults>
</compile_context>

<pallas_src>
import math

import jax
import jax.numpy as jnp
from jax.experimental import pallas as pl
from jax.experimental.pallas import tpu as pltpu

D_IN = 16          # latent feature dim (hid_dim)
DIM_T = 32         # denoiser time-embedding / MLP width
LANE = 128         # batch tile granularity (batch lives on the lane axis)
TB_MAX = 1024      # max batch tile (VMEM footprint @1024 is ~<1 MiB, huge headroom)

# Packed slab geometry (feature-major / transposed weights).
DATA_ROWS = 40                                   # 16 xn + 16 y + 1 sigma + 1 mask + pad
W_ROWS = 3 * DIM_T + 2 * (2 * DIM_T) + DIM_T + D_IN   # 272 transposed weight rows
BIAS_ROWS = 3 * DIM_T + 2 * (2 * DIM_T) + DIM_T + D_IN + DIM_T // 2  # 288 (biases + freqs)

P_MEAN = -1.2
P_STD = 1.2
SIGMA_DATA = 0.5


def _cdiv(a, b):
    return -(-a // b)


def _round_up(a, b):
    return _cdiv(a, b) * b


def _num_tensorcores():
    """2 TensorCores per device on megacore parts (v7x / v4), else 1."""
    try:
        kind = jax.devices()[0].device_kind.lower()
    except Exception:
        return 1
    return 2 if ("v7" in kind or "v4" in kind) else 1


NUM_TC = _num_tensorcores()


def _tile_and_pad(b, num_tc):
    """Pick a batch tile (multiple of 128 lanes). Force >=2 tiles only on
    megacore parts so the parallel grid axis can split across both TCs."""
    n_tiles = max(1, _cdiv(b, TB_MAX))
    if num_tc >= 2 and n_tiles < 2 and b > LANE:
        n_tiles = 2
    tb = _round_up(_cdiv(b, n_tiles), LANE)
    b_pad = tb * _cdiv(b, tb)
    return tb, b_pad


def edm_loss_kernel(data_ref, wts_ref, bias_ref, out_ref):
    # ---- per-row input slab, feature-major: (rows, tb) with batch on lanes
    xn = data_ref[0:D_IN, :]                     # (16, tb)  y + n
    y = data_ref[D_IN:2 * D_IN, :]               # (16, tb)  clean target
    sigma = data_ref[2 * D_IN:2 * D_IN + 1, :]   # (1, tb)
    valid = data_ref[2 * D_IN + 1:2 * D_IN + 2, :]  # (1, tb) padded-lane mask

    # ---- Precond coefficients (per-column scalars, lane-dense, EUP-heavy)
    sd = SIGMA_DATA
    s2 = sigma * sigma
    denom = s2 + sd * sd
    r = jax.lax.rsqrt(denom)
    c_skip = (sd * sd) * pl.reciprocal(denom, approx=True)
    c_out = sigma * sd * r
    c_in = r
    weight = denom * pl.reciprocal((sigma * sd) * (sigma * sd), approx=True)
    c_noise = jnp.log(sigma) * 0.25              # (1, tb)

    # ---- PositionalEmbedding(DIM_T) with tabsyn's sin/cos swap:
    # final emb rows = [sin(c*f_k) | cos(c*f_k)],  f_k = (1/10000)^(k/(DIM_T/2))
    # freqs are precomputed on the host (bias slab rows 272:288).
    freqs = bias_ref[W_ROWS:BIAS_ROWS, :]        # (16, 1)
    arg = freqs * c_noise                        # (16, tb)
    emb = jnp.concatenate([jnp.sin(arg), jnp.cos(arg)], axis=0)   # (32, tb)

    # ---- packed parameters (weights transposed bf16, biases f32 columns)
    wp = wts_ref[0:32, 0:D_IN]                   # proj^T          (32, 16)
    wt1 = wts_ref[32:64, 0:DIM_T]                # time_embed[0]^T (32, 32)
    wt2 = wts_ref[64:96, 0:DIM_T]                # time_embed[2]^T (32, 32)
    w1 = wts_ref[96:160, 0:DIM_T]                # mlp[0]^T        (64, 32)
    w2 = wts_ref[160:224, 0:2 * DIM_T]           # mlp[2]^T        (64, 64)
    w3 = wts_ref[224:256, 0:2 * DIM_T]           # mlp[4]^T        (32, 64)
    w4 = wts_ref[256:272, 0:DIM_T]               # mlp[6]^T        (16, 32)

    bp = bias_ref[0:32, :]                       # (32, 1)
    bt1 = bias_ref[32:64, :]
    bt2 = bias_ref[64:96, :]
    b1 = bias_ref[96:160, :]                     # (64, 1)
    b2 = bias_ref[160:224, :]
    b3 = bias_ref[224:256, :]
    b4 = bias_ref[256:272, :]                    # (16, 1)

    bf = jnp.bfloat16
    f32 = jnp.float32

    def silu(v):
        # x * sigmoid(x) with an approx EUP reciprocal (vrcp) for the divide.
        return v * pl.reciprocal(1.0 + jnp.exp(-v), approx=True)

    # ---- time_embed: Linear -> SiLU -> Linear   (feature-major: W^T @ x + b)
    t = silu(jnp.dot(wt1, emb.astype(bf), preferred_element_type=f32) + bt1)
    t = jnp.dot(wt2, t.astype(bf), preferred_element_type=f32) + bt2

    # ---- proj(c_in * x_noisy) + emb, then 4-layer SiLU MLP
    x_in = (c_in * xn).astype(bf)
    h = jnp.dot(wp, x_in, preferred_element_type=f32) + bp + t
    h = silu(jnp.dot(w1, h.astype(bf), preferred_element_type=f32) + b1)
    h = silu(jnp.dot(w2, h.astype(bf), preferred_element_type=f32) + b2)
    h = silu(jnp.dot(w3, h.astype(bf), preferred_element_type=f32) + b3)
    f_x = jnp.dot(w4, h.astype(bf), preferred_element_type=f32) + b4     # (16, tb)

    # ---- Precond mixing + weighted squared error, reduced to one scalar/tile
    d_x = c_skip * xn + c_out * f_x
    per_elem = (weight * valid) * (d_x - y) ** 2         # padded lanes -> 0
    tile_sum = jnp.sum(per_elem)                          # f32 scalar
    out_ref[...] = jnp.full(out_ref.shape, tile_sum, dtype=out_ref.dtype)


def init_denoiser_params(key):
    """Deterministic synthetic weights for the MLPDiffusion denoiser."""
    ks = jax.random.split(key, 7)

    def lin(k, fan_in, fan_out):
        w = jax.random.normal(k, (fan_in, fan_out), jnp.float32) / jnp.sqrt(fan_in)
        b = jnp.zeros((1, fan_out), jnp.float32)
        return w, b

    wp, bp = lin(ks[0], D_IN, DIM_T)            # proj
    wt1, bt1 = lin(ks[1], DIM_T, DIM_T)         # time_embed[0]
    wt2, bt2 = lin(ks[2], DIM_T, DIM_T)         # time_embed[2]
    w1, b1 = lin(ks[3], DIM_T, 2 * DIM_T)       # mlp[0]
    w2, b2 = lin(ks[4], 2 * DIM_T, 2 * DIM_T)   # mlp[2]
    w3, b3 = lin(ks[5], 2 * DIM_T, DIM_T)       # mlp[4]
    w4, b4 = lin(ks[6], DIM_T, D_IN)            # mlp[6]
    return (wp, bp, wt1, bt1, wt2, bt2, w1, b1, w2, b2, w3, b3, w4, b4)


def pack_params(params):
    """Pack the 14 weight/bias tensors into one transposed bf16 weight slab
    (272, 64) and one f32 bias/freqs column slab (288, 1)."""
    (wp, bp, wt1, bt1, wt2, bt2, w1, b1, w2, b2, w3, b3, w4, b4) = params

    def padw_t(w):
        wt = w.T                                            # (out, in)
        return jnp.pad(wt, ((0, 0), (0, 2 * DIM_T - wt.shape[1])))

    wts = jnp.concatenate(
        [padw_t(wp), padw_t(wt1), padw_t(wt2), padw_t(w1), padw_t(w2),
         padw_t(w3), padw_t(w4)], axis=0).astype(jnp.bfloat16)    # (272, 64) bf16
    assert wts.shape == (W_ROWS, 2 * DIM_T)

    half = DIM_T // 2
    k = jnp.arange(half, dtype=jnp.float32)
    freqs = jnp.exp(k * (-math.log(10000.0) / half))              # (16,)

    def col(v):
        return jnp.asarray(v, jnp.float32).reshape(-1, 1)

    bias = jnp.concatenate(
        [col(bp), col(bt1), col(bt2), col(b1), col(b2), col(b3), col(b4),
         col(freqs)], axis=0)                                      # (288, 1) f32
    assert bias.shape == (BIAS_ROWS, 1)
    return wts, bias


@jax.jit
def model_forward(x, key, wts_packed, bias_packed):
    """Reproduces Model.forward(x): scalar EDM training loss."""
    x = x.astype(jnp.float32)
    b = x.shape[0]
    tb, b_pad = _tile_and_pad(b, NUM_TC)
    pad = b_pad - b

    k_sigma, k_noise = jax.random.split(key)

    # EDMLoss noise sampling (stays in plain JAX), built feature-major.
    rnd_normal = jax.random.normal(k_sigma, (b,), jnp.float32)
    sigma = jnp.exp(rnd_normal * P_STD + P_MEAN)                   # (B,)
    xt = x.T                                                       # (D_IN, B)
    n = jax.random.normal(k_noise, (D_IN, b), jnp.float32) * sigma[None, :]
    xn_t = xt + n

    if pad:
        xt = jnp.pad(xt, ((0, 0), (0, pad)))
        xn_t = jnp.pad(xn_t, ((0, 0), (0, pad)))
        sigma_p = jnp.pad(sigma, (0, pad), constant_values=1.0)    # keep log finite
        mask = jnp.pad(jnp.ones((b,), jnp.float32), (0, pad))
    else:
        sigma_p = sigma
        mask = jnp.ones((b,), jnp.float32)

    # Single per-row slab: rows [x_noisy | y | sigma | mask | zero-pad].
    data = jnp.concatenate(
        [xn_t, xt, sigma_p[None, :], mask[None, :],
         jnp.zeros((DATA_ROWS - 2 * D_IN - 2, b_pad), jnp.float32)],
        axis=0)                                                    # (40, B_pad)

    grid = (b_pad // tb,)

    # TODO(synk): on v7x, optionally try dimension_semantics=(pltpu.CORE_PARALLEL,)
    # and confirm with a trace that both TensorCores are active.
    partial = pl.pallas_call(
        edm_loss_kernel,
        out_shape=jax.ShapeDtypeStruct((grid[0], 8, 128), jnp.float32),
        grid_spec=pltpu.PrefetchScalarGridSpec(
            num_scalar_prefetch=0,
            grid=grid,
            in_specs=[
                pl.BlockSpec((DATA_ROWS, tb), lambda i: (0, i)),        # data slab
                pl.BlockSpec((W_ROWS, 2 * DIM_T), lambda i: (0, 0)),    # weights (bf16)
                pl.BlockSpec((BIAS_ROWS, 1), lambda i: (0, 0)),         # biases + freqs
            ],
            out_specs=pl.BlockSpec((1, 8, 128), lambda i: (i, 0, 0)),
        ),
        compiler_params=pltpu.CompilerParams(
            dimension_semantics=("parallel",)),
    )(data, wts_packed, bias_packed)

    # Per-tile sums (broadcast into each lane-dense block) -> global mean.
    total = partial[:, 0, 0].sum()
    return total / (b * D_IN)


if __name__ == "__main__":
    key = jax.random.PRNGKey(0)
    k_data, k_params, k_loss = jax.random.split(key, 3)

    B = 64
    x = jax.random.normal(k_data, (B, D_IN), jnp.float32)
    params = init_denoiser_params(k_params)
    wts_packed, bias_packed = pack_params(params)

    out = model_forward(x, k_loss, wts_packed, bias_packed)
    out = jax.block_until_ready(out)
    assert out.shape == () and out.dtype == jnp.float32
    assert bool(jnp.isfinite(out))
    print("KERNEL_OK")
</pallas_src>

<mosaic_0001>
module attributes {stable_mosaic.version = 11 : i64} {
  func.func @edm_loss_kernel(%arg0: i32, %arg1: memref<40x128xf32, #tpu.memory_space<vmem>>, %arg2: memref<272x64xbf16, #tpu.memory_space<vmem>>, %arg3: memref<288x1xf32, #tpu.memory_space<vmem>>, %arg4: memref<1x8x128xf32, #tpu.memory_space<vmem>>) attributes {dimension_semantics = [#tpu.dimension_semantics<parallel>], iteration_bounds = array<i64: 1>, scalar_prefetch = 0 : i64, scratch_operands = 0 : i64, tpu.core_type = #tpu.core_type<tc>, window_params = [{transform_indices = @transform_0, window_bounds = array<i64: 40, 128>}, {pipeline_mode = #tpu.pipeline_mode<synchronous>, transform_indices = @transform_1, window_bounds = array<i64: 272, 64>}, {pipeline_mode = #tpu.pipeline_mode<synchronous>, transform_indices = @transform_2, window_bounds = array<i64: 288, 1>}, {transform_indices = @transform_3, window_bounds = array<i64: 1, 8, 128>}]} {
    %c0 = arith.constant 0 : index
    %c0_0 = arith.constant 0 : index
    %0 = vector.load %arg1[%c0, %c0_0] : memref<40x128xf32, #tpu.memory_space<vmem>>, vector<16x128xf32>
    %c16 = arith.constant 16 : index
    %c0_1 = arith.constant 0 : index
    %1 = vector.load %arg1[%c16, %c0_1] : memref<40x128xf32, #tpu.memory_space<vmem>>, vector<16x128xf32>
    %c32 = arith.constant 32 : index
    %c0_2 = arith.constant 0 : index
    %2 = vector.load %arg1[%c32, %c0_2] : memref<40x128xf32, #tpu.memory_space<vmem>>, vector<1x128xf32>
    %c33 = arith.constant 33 : index
    %c0_3 = arith.constant 0 : index
    %3 = vector.load %arg1[%c33, %c0_3] : memref<40x128xf32, #tpu.memory_space<vmem>>, vector<1x128xf32>
    %4 = arith.mulf %2, %2 : vector<1x128xf32>
    %cst = arith.constant 2.500000e-01 : f32
    %5 = vector.broadcast %cst : f32 to vector<1x128xf32>
    %6 = arith.addf %4, %5 : vector<1x128xf32>
    %7 = math.rsqrt %6 : vector<1x128xf32>
    %8 = tpu.reciprocal %6 {approx = true} : vector<1x128xf32> -> vector<1x128xf32>
    %cst_4 = arith.constant 2.500000e-01 : f32
    %9 = vector.broadcast %cst_4 : f32 to vector<1x128xf32>
    %10 = arith.mulf %9, %8 : vector<1x128xf32>
    %cst_5 = arith.constant 5.000000e-01 : f32
    %11 = vector.broadcast %cst_5 : f32 to vector<1x128xf32>
    %12 = arith.mulf %2, %11 : vector<1x128xf32>
    %13 = arith.mulf %12, %7 : vector<1x128xf32>
    %cst_6 = arith.constant 5.000000e-01 : f32
    %14 = vector.broadcast %cst_6 : f32 to vector<1x128xf32>
    %15 = arith.mulf %2, %14 : vector<1x128xf32>
    %cst_7 = arith.constant 5.000000e-01 : f32
    %16 = vector.broadcast %cst_7 : f32 to vector<1x128xf32>
    %17 = arith.mulf %2, %16 : vector<1x128xf32>
    %18 = arith.mulf %15, %17 : vector<1x128xf32>
    %19 = tpu.reciprocal %18 {approx = true} : vector<1x128xf32> -> vector<1x128xf32>
    %20 = arith.mulf %6, %19 : vector<1x128xf32>
    %21 = math.log %2 : vector<1x128xf32>
    %cst_8 = arith.constant 2.500000e-01 : f32
    %22 = vector.broadcast %cst_8 : f32 to vector<1x128xf32>
    %23 = arith.mulf %21, %22 : vector<1x128xf32>
    %c272 = arith.constant 272 : index
    %c0_9 = arith.constant 0 : index
    %24 = vector.load %arg3[%c272, %c0_9] : memref<288x1xf32, #tpu.memory_space<vmem>>, vector<16x1xf32>
    %25 = vector.broadcast %24 : vector<16x1xf32> to vector<16x128xf32>
    %26 = vector.broadcast %23 : vector<1x128xf32> to vector<16x128xf32>
    %27 = arith.mulf %25, %26 : vector<16x128xf32>
    %28 = math.sin %27 : vector<16x128xf32>
    %29 = math.cos %27 : vector<16x128xf32>
    %30 = tpu.concatenate %28, %29 in 0 : vector<16x128xf32>, vector<16x128xf32> -> vector<32x128xf32>
    %c0_10 = arith.constant 0 : index
    %c0_11 = arith.constant 0 : index
    %31 = vector.load %arg2[%c0_10, %c0_11] : memref<272x64xbf16, #tpu.memory_space<vmem>>, vector<32x16xbf16>
    %c32_12 = arith.constant 32 : index
    %c0_13 = arith.constant 0 : index
    %32 = vector.load %arg2[%c32_12, %c0_13] : memref<272x64xbf16, #tpu.memory_space<vmem>>, vector<32x32xbf16>
    %c64 = arith.constant 64 : index
    %c0_14 = arith.constant 0 : index
    %33 = vector.load %arg2[%c64, %c0_14] : memref<272x64xbf16, #tpu.memory_space<vmem>>, vector<32x32xbf16>
    %c96 = arith.constant 96 : index
    %c0_15 = arith.constant 0 : index
    %34 = vector.load %arg2[%c96, %c0_15] : memref<272x64xbf16, #tpu.memory_space<vmem>>, vector<64x32xbf16>
    %c160 = arith.constant 160 : index
    %c0_16 = arith.constant 0 : index
    %35 = vector.load %arg2[%c160, %c0_16] : memref<272x64xbf16, #tpu.memory_space<vmem>>, vector<64x64xbf16>
    %c224 = arith.constant 224 : index
    %c0_17 = arith.constant 0 : index
    %36 = vector.load %arg2[%c224, %c0_17] : memref<272x64xbf16, #tpu.memory_space<vmem>>, vector<32x64xbf16>
    %c256 = arith.constant 256 : index
    %c0_18 = arith.constant 0 : index
    %37 = vector.load %arg2[%c256, %c0_18] : memref<272x64xbf16, #tpu.memory_space<vmem>>, vector<16x32xbf16>
    %c0_19 = arith.constant 0 : index
    %c0_20 = arith.constant 0 : index
    %38 = vector.load %arg3[%c0_19, %c0_20] : memref<288x1xf32, #tpu.memory_space<vmem>>, vector<32x1xf32>
    %c32_21 = arith.constant 32 : index
    %c0_22 = arith.constant 0 : index
    %39 = vector.load %arg3[%c32_21, %c0_22] : memref<288x1xf32, #tpu.memory_space<vmem>>, vector<32x1xf32>
    %c64_23 = arith.constant 64 : index
    %c0_24 = arith.constant 0 : index
    %40 = vector.load %arg3[%c64_23, %c0_24] : memref<288x1xf32, #tpu.memory_space<vmem>>, vector<32x1xf32>
    %c96_25 = arith.constant 96 : index
    %c0_26 = arith.constant 0 : index
    %41 = vector.load %arg3[%c96_25, %c0_26] : memref<288x1xf32, #tpu.memory_space<vmem>>, vector<64x1xf32>
    %c160_27 = arith.constant 160 : index
    %c0_28 = arith.constant 0 : index
    %42 = vector.load %arg3[%c160_27, %c0_28] : memref<288x1xf32, #tpu.memory_space<vmem>>, vector<64x1xf32>
    %c224_29 = arith.constant 224 : index
    %c0_30 = arith.constant 0 : index
    %43 = vector.load %arg3[%c224_29, %c0_30] : memref<288x1xf32, #tpu.memory_space<vmem>>, vector<32x1xf32>
    %c256_31 = arith.constant 256 : index
    %c0_32 = arith.constant 0 : index
    %44 = vector.load %arg3[%c256_31, %c0_32] : memref<288x1xf32, #tpu.memory_space<vmem>>, vector<16x1xf32>
    %45 = arith.truncf %30 : vector<32x128xf32> to vector<32x128xbf16>
    %cst_33 = arith.constant dense<0.000000e+00> : vector<32x128xf32>
    %46 = tpu.matmul %32, %45, %cst_33 {dimension_numbers = #tpu.dot_dimension_numbers<[1], [0], [0], [1], [0, 0, 1, 1], [], []>} : vector<32x32xbf16>, vector<32x128xbf16>, vector<32x128xf32> -> vector<32x128xf32>
    %47 = vector.broadcast %39 : vector<32x1xf32> to vector<32x128xf32>
    %48 = arith.addf %46, %47 : vector<32x128xf32>
    %cst_34 = arith.constant 0.000000e+00 : f32
    %49 = vector.broadcast %cst_34 : f32 to vector<32x128xf32>
    %50 = arith.subf %49, %48 : vector<32x128xf32>
    %51 = math.exp %50 : vector<32x128xf32>
    %cst_35 = arith.constant 1.000000e+00 : f32
    %52 = vector.broadcast %cst_35 : f32 to vector<32x128xf32>
    %53 = arith.addf %52, %51 : vector<32x128xf32>
    %54 = tpu.reciprocal %53 {approx = true} : vector<32x128xf32> -> vector<32x128xf32>
    %55 = arith.mulf %48, %54 : vector<32x128xf32>
    %56 = arith.truncf %55 : vector<32x128xf32> to vector<32x128xbf16>
    %cst_36 = arith.constant dense<0.000000e+00> : vector<32x128xf32>
    %57 = tpu.matmul %33, %56, %cst_36 {dimension_numbers = #tpu.dot_dimension_numbers<[1], [0], [0], [1], [0, 0, 1, 1], [], []>} : vector<32x32xbf16>, vector<32x128xbf16>, vector<32x128xf32> -> vector<32x128xf32>
    %58 = vector.broadcast %40 : vector<32x1xf32> to vector<32x128xf32>
    %59 = arith.addf %57, %58 : vector<32x128xf32>
    %60 = vector.broadcast %7 : vector<1x128xf32> to vector<16x128xf32>
    %61 = arith.mulf %60, %0 : vector<16x128xf32>
    %62 = arith.truncf %61 : vector<16x128xf32> to vector<16x128xbf16>
    %cst_37 = arith.constant dense<0.000000e+00> : vector<32x128xf32>
    %63 = tpu.matmul %31, %62, %cst_37 {dimension_numbers = #tpu.dot_dimension_numbers<[1], [0], [0], [1], [0, 0, 1, 1], [], []>} : vector<32x16xbf16>, vector<16x128xbf16>, vector<32x128xf32> -> vector<32x128xf32>
    %64 = vector.broadcast %38 : vector<32x1xf32> to vector<32x128xf32>
    %65 = arith.addf %63, %64 : vector<32x128xf32>
    %66 = arith.addf %65, %59 : vector<32x128xf32>
    %67 = arith.truncf %66 : vector<32x128xf32> to vector<32x128xbf16>
    %cst_38 = arith.constant dense<0.000000e+00> : vector<64x128xf32>
    %68 = tpu.matmul %34, %67, %cst_38 {dimension_numbers = #tpu.dot_dimension_numbers<[1], [0], [0], [1], [0, 0, 1, 1], [], []>} : vector<64x32xbf16>, vector<32x128xbf16>, vector<64x128xf32> -> vector<64x128xf32>
    %69 = vector.broadcast %41 : vector<64x1xf32> to vector<64x128xf32>
    %70 = arith.addf %68, %69 : vector<64x128xf32>
    %cst_39 = arith.constant 0.000000e+00 : f32
    %71 = vector.broadcast %cst_39 : f32 to vector<64x128xf32>
    %72 = arith.subf %71, %70 : vector<64x128xf32>
    %73 = math.exp %72 : vector<64x128xf32>
    %cst_40 = arith.constant 1.000000e+00 : f32
    %74 = vector.broadcast %cst_40 : f32 to vector<64x128xf32>
    %75 = arith.addf %74, %73 : vector<64x128xf32>
    %76 = tpu.reciprocal %75 {approx = true} : vector<64x128xf32> -> vector<64x128xf32>
    %77 = arith.mulf %70, %76 : vector<64x128xf32>
    %78 = arith.truncf %77 : vector<64x128xf32> to vector<64x128xbf16>
    %cst_41 = arith.constant dense<0.000000e+00> : vector<64x128xf32>
    %79 = tpu.matmul %35, %78, %cst_41 {dimension_numbers = #tpu.dot_dimension_numbers<[1], [0], [0], [1], [0, 0, 1, 1], [], []>} : vector<64x64xbf16>, vector<64x128xbf16>, vector<64x128xf32> -> vector<64x128xf32>
    %80 = vector.broadcast %42 : vector<64x1xf32> to vector<64x128xf32>
    %81 = arith.addf %79, %80 : vector<64x128xf32>
    %cst_42 = arith.constant 0.000000e+00 : f32
    %82 = vector.broadcast %cst_42 : f32 to vector<64x128xf32>
    %83 = arith.subf %82, %81 : vector<64x128xf32>
    %84 = math.exp %83 : vector<64x128xf32>
    %cst_43 = arith.constant 1.000000e+00 : f32
    %85 = vector.broadcast %cst_43 : f32 to vector<64x128xf32>
    %86 = arith.addf %85, %84 : vector<64x128xf32>
    %87 = tpu.reciprocal %86 {approx = true} : vector<64x128xf32> -> vector<64x128xf32>
    %88 = arith.mulf %81, %87 : vector<64x128xf32>
    %89 = arith.truncf %88 : vector<64x128xf32> to vector<64x128xbf16>
    %cst_44 = arith.constant dense<0.000000e+00> : vector<32x128xf32>
    %90 = tpu.matmul %36, %89, %cst_44 {dimension_numbers = #tpu.dot_dimension_numbers<[1], [0], [0], [1], [0, 0, 1, 1], [], []>} : vector<32x64xbf16>, vector<64x128xbf16>, vector<32x128xf32> -> vector<32x128xf32>
    %91 = vector.broadcast %43 : vector<32x1xf32> to vector<32x128xf32>
    %92 = arith.addf %90, %91 : vector<32x128xf32>
    %cst_45 = arith.constant 0.000000e+00 : f32
    %93 = vector.broadcast %cst_45 : f32 to vector<32x128xf32>
    %94 = arith.subf %93, %92 : vector<32x128xf32>
    %95 = math.exp %94 : vector<32x128xf32>
    %cst_46 = arith.constant 1.000000e+00 : f32
    %96 = vector.broadcast %cst_46 : f32 to vector<32x128xf32>
    %97 = arith.addf %96, %95 : vector<32x128xf32>
    %98 = tpu.reciprocal %97 {approx = true} : vector<32x128xf32> -> vector<32x128xf32>
    %99 = arith.mulf %92, %98 : vector<32x128xf32>
    %100 = arith.truncf %99 : vector<32x128xf32> to vector<32x128xbf16>
    %cst_47 = arith.constant dense<0.000000e+00> : vector<16x128xf32>
    %101 = tpu.matmul %37, %100, %cst_47 {dimension_numbers = #tpu.dot_dimension_numbers<[1], [0], [0], [1], [0, 0, 1, 1], [], []>} : vector<16x32xbf16>, vector<32x128xbf16>, vector<16x128xf32> -> vector<16x128xf32>
    %102 = vector.broadcast %44 : vector<16x1xf32> to vector<16x128xf32>
    %103 = arith.addf %101, %102 : vector<16x128xf32>
    %104 = vector.broadcast %10 : vector<1x128xf32> to vector<16x128xf32>
    %105 = arith.mulf %104, %0 : vector<16x128xf32>
    %106 = vector.broadcast %13 : vector<1x128xf32> to vector<16x128xf32>
    %107 = arith.mulf %106, %103 : vector<16x128xf32>
    %108 = arith.addf %105, %107 : vector<16x128xf32>
    %109 = arith.mulf %20, %3 : vector<1x128xf32>
    %110 = arith.subf %108, %1 : vector<16x128xf32>
    %111 = arith.mulf %110, %110 : vector<16x128xf32>
    %112 = vector.broadcast %109 : vector<1x128xf32> to vector<16x128xf32>
    %113 = arith.mulf %112, %111 : vector<16x128xf32>
    %114 = vector.shape_cast %113 : vector<16x128xf32> to vector<1x16x128xf32>
    %cst_48 = arith.constant dense<0.000000e+00> : vector<1xf32>
    %115 = vector.multi_reduction <add>, %114, %cst_48 [1, 2] : vector<1x16x128xf32> to vector<1xf32>
    %116 = vector.shape_cast %115 : vector<1xf32> to vector<1x1x1xf32>
    %117 = vector.extract %116[0, 0, 0] : f32 from vector<1x1x1xf32>
    %118 = vector.broadcast %117 : f32 to vector<1x8x128xf32>
    %c0_49 = arith.constant 0 : index
    %c0_50 = arith.constant 0 : index
    %c0_51 = arith.constant 0 : index
    %119 = vector.load %arg4[%c0_49, %c0_50, %c0_51] : memref<1x8x128xf32, #tpu.memory_space<vmem>>, vector<1x8x128xf32>
    tpu.vector_store %arg4[%c0_49, %c0_50, %c0_51], %118 {strides = array<i32>} : memref<1x8x128xf32, #tpu.memory_space<vmem>>, vector<1x8x128xf32>,
    return
  }
  func.func @transform_0(%arg0: i32) -> (i32, i32) {
    %c0_i32 = arith.constant 0 : i32
    %c0_i32_0 = arith.constant 0 : i32
    return %c0_i32, %arg0 : i32, i32
  }
  func.func @transform_1(%arg0: i32) -> (i32, i32) {
    %c0_i32 = arith.constant 0 : i32
    %c0_i32_0 = arith.constant 0 : i32
    %c0_i32_1 = arith.constant 0 : i32
    return %c0_i32, %c0_i32_0 : i32, i32
  }
  func.func @transform_2(%arg0: i32) -> (i32, i32) {
    %c0_i32 = arith.constant 0 : i32
    %c0_i32_0 = arith.constant 0 : i32
    %c0_i32_1 = arith.constant 0 : i32
    return %c0_i32, %c0_i32_0 : i32, i32
  }
  func.func @transform_3(%arg0: i32) -> (i32, i32, i32) {
    %c0_i32 = arith.constant 0 : i32
    %c0_i32_0 = arith.constant 0 : i32
    %c0_i32_1 = arith.constant 0 : i32
    return %arg0, %c0_i32, %c0_i32_0 : i32, i32, i32
  }
}

</mosaic_0001>

<bundles_post_ra>
// kernel: model_forward.3
= control target key start
LH: loop header
LB: loop body
LE: loop exit
PB: predicated region body
PF: predicated region fallthrough
CT: control target
= control target key end

     0   :  { %v1635_v0 = vmov 0   ;;  %vm917_vm3 = vcmask 130048   ;;  %v1636_v54 = vmov 2102212464   ;;  %v1637_v56 = vmov 920167782   ;;  %s2107_s2 = inlined_call_operand.vmem [shape: f32[288,1], index: 2, kind: input, shape index: {}]   ;;  %s2108_s0 = inlined_call_operand.vmem [shape: f32[40,128], index: 0, kind: input, shape index: {}]   ;;  %s2109_s1 = inlined_call_operand.vmem [shape: bf16[272,64], index: 1, kind: input, shape index: {}]   ;;  %s2110_s3 = inlined_call_operand.vmem [shape: f32[1,8,128], index: 3, kind: output, shape index: {}]  }
   0x1   :  { %1525 = vset.pattern.permute.xlu0 %v1635_v0  ;;  %v43_v1 = vld [vmem:[%s2107_s2 + $0x110] sm:$0xff]  ;;  %1526 = vset.pattern.permute.xlu1 %v1635_v0  ;;  %v19_v2 = vld [vmem:[%s2108_s0 + $0x20] sm:$0x1]  ;;  %v44_v5 = vld [vmem:[%s2107_s2 + $0x118] sm:$0xff]  ;;  %v1638_v59 = vmov 683565275  }
   0x2   :  { %47 = vperm.xlu0 %1525, %v43_v1   ;;  %1527 = vset.pattern.permute.xlu2 %v1635_v0  ;;  %v21_v3 = vmul.f32 %v19_v2, %v19_v2  ;;  %v720_v7 = vld [vmem:[%s2107_s2 + $0x50] sm:$0xff]  ;;  %v713_v12 = vld [vmem:[%s2107_s2 + $0x18] sm:$0xff]  ;;  %v15_v14 = vld [vmem:[%s2108_s0] sm:$0xff]  ;;  %v1639_v62 = vmov 1326507024  }
   0x3   :  { %v16_v15 = vld [vmem:[%s2108_s0 + $0x8] sm:$0xff]  ;;  %v710_v22 = vld [vmem:[%s2107_s2] sm:$0xff]  ;;  %v729_v23 = vld [vmem:[%s2107_s2 + $0x98] sm:$0xff]  ;;  %v1640_v1 = vmov 2475754826  }
   0x4   :  { %v1671_v4 = vadd.f32 0.25, %v21_v3  ;;  %v1499_v21 = vld [vmem:[%s2109_s1 + $0x8] sm:$0xff]  ;;  %v724_v24 = vld [vmem:[%s2107_s2 + $0x70] sm:$0xff]  ;;  %v734_v26 = vld [vmem:[%s2107_s2 + $0xc0] sm:$0xff] }
   0x5   :  { %v723_v25 = vld [vmem:[%s2107_s2 + $0x68] sm:$0xff]  ;;  %v733_v27 = vld [vmem:[%s2107_s2 + $0xb8] sm:$0xff]  ;;  %v740_v28 = vld [vmem:[%s2107_s2 + $0xf0] sm:$0xff] }
   0x6   :  { %1528 = vrsqrt.f32 %v1671_v4  ;;  %vm29_vm0 = vweird.f32 %v1671_v4  ;;  %v739_v29 = vld [vmem:[%s2107_s2 + $0xe8] sm:$0xff] }
   0x7   :  { %1530 = vlog2.f32 %v19_v2 }
   0xa   :  { %52 = vperm.xlu0 %1525, %v44_v5  }
   0xc   :  { %v1529_v6 = vpop.eup %1528 }
   0xd   :  { %v24_v8 = vmul.f32 %v1529_v6, %v1671_v4  ;;  %vm30_vm1 = vweird.f32 %v1529_v6  ;;  %v1531_v30 = vpop.eup %1530 }
   0xe   :  { %vm31_vm2 = vmor %vm29_vm0, %vm30_vm1  ;;  %v41_v31 = vmul.f32 0.6931472, %v1531_v30 }
   0xf   :  { %v25_v9 = vmul.f32 %v1529_v6, %v24_v8 }
  0x10   :  { %v42_v32 = vmul.f32 0.25, %v41_v31 }
  0x11   :  { %v26_v10 = vmul.f32 0.5, %v25_v9 }
  0x12   :  { %840 = vperm.xlu0 %1525, %v720_v7   ;;  %v55_v33 = vperm.slane %v42_v32, 0  ;;  %v1641_v7 = vmov 2131351028  }
  0x13   :  { %v27_v11 = vsub.f32 1.5, %v26_v10 }
  0x15   :  { %v28_v13 = vmul.f32 %v1529_v6, %v27_v11 }
  0x17   :  { %v1691_v16 = vsel %vm31_vm2, %v1529_v6, %v28_v13  ;;  %v716_v6 = vld [vmem:[%s2107_s2 + $0x30] sm:$0xff] }
  0x18   :  { %v883_v17 = vperm.slane %v1691_v16, 0  ;;  %758 = vperm.xlu1 %1526, %v716_v6  }
  0x1a   :  { %904 = vperm.xlu0 %1525, %v713_v12   ;;  %v884_v18 = vmul.f32 %v883_v17, %v15_v14  ;;  %v885_v19 = vmul.f32 %v883_v17, %v16_v15 }
  0x1c   :  { %v1694_v20 = vpack.c.bf16 %v885_v19, %v884_v18 }
  0x1e   :  { %1515 = vmatpush.bf16.msra.mxu2 %v1694_v20 }
  0x21   :  { %1442 = vmatmul.msk.bf16.vlgmr.msra.gmra.mxu2 %vm917_vm3, %v1499_v21 }
  0x22   :  { %889 = vperm.xlu0 %1525, %v710_v22  }
  0x2a   :  { %986 = vperm.xlu0 %1525, %v729_v23  }
  0x32   :  { %961 = vperm.xlu0 %1525, %v724_v24  }
  0x3a   :  { %956 = vperm.xlu0 %1525, %v723_v25  }
  0x42   :  { %1124 = vperm.xlu0 %1525, %v734_v26  }
  0x4a   :  { %1119 = vperm.xlu0 %1525, %v733_v27  }
  0x52   :  { %1268 = vperm.xlu0 %1525, %v740_v28  }
  0x5a   :  { %1263 = vperm.xlu0 %1525, %v739_v29  }
  0x74   :  { %v48_v34 = vpop.permute.xlu0 %47 }
  0x75   :  { %v1725_v35 = vmul.f32 %v55_v33, %v48_v34 }
  0x77   :  { %v61_v36 = vand.u32 2139095040, %v1725_v35  ;;  %v58_v37 = vand.u32 2147483647, %v1725_v35 }
  0x79   :  { %v62_v38 = vshrl.u32 %v61_v36, 23  ;;  %v65_v39 = vand.u32 8388607, %v58_v37 }
  0x7b   :  { %v1401_v40 = vadd.s32 4294967169, %v62_v38  ;;  %v66_v41 = vor.u32 8388608, %v65_v39 }
  0x7c   :  { %v53_v42 = vpop.permute.xlu0 %52 }
  0x7d   :  { %v68_v43 = vadd.s32 1, %v1401_v40  ;;  %v1731_v44 = vmul.f32 %v55_v33, %v53_v42  ;;  %v1734_v46 = vshll.u32 %v66_v41, 8  ;;  %v717_v42 = vld [vmem:[%s2107_s2 + $0x38] sm:$0xff] }
  0x7e   :  { %763 = vperm.xlu1 %1526, %v717_v42  }
  0x7f   :  { %vm69_vm4 = vcmp.gt.s32.totalorder %v68_v43, 0  ;;  %v216_v45 = vand.u32 2139095040, %v1731_v44  ;;  %v1739_v52 = vand.u32 65535, %v1734_v46  ;;  %v213_v53 = vand.u32 2147483647, %v1731_v44 }
  0x80   :  { %v70_v47 = vsel %vm69_vm4, %v68_v43, 0  ;;  %v108_v43 = vshrl.u32 %v1734_v46, 16 }
  0x81   :  { %v72_v48 = vand.u32 31, %v70_v47  ;;  %v217_v49 = vshrl.u32 %v216_v45, 23  ;;  %v1736_v50 = vshrl.u32 %v70_v47, 5  ;;  %v1760_v28 = vand.u32 8388607, %v213_v53 }
  0x83   :  { %v73_v51 = vsub.s32 32, %v72_v48  ;;  %v84_v55 = vshll.u32 %v1636_v54, %v72_v48  ;;  %v87_v57 = vshll.u32 %v1637_v56, %v72_v48  ;;  %v1404_v58 = vadd.s32 4294967169, %v217_v49 }
  0x84   :  { %v75_v60 = vshll.u32 %v1638_v59, %v72_v48  ;;  %v78_v3 = vshll.u32 %v1640_v1, %v72_v48  ;;  %v81_v9 = vshll.u32 %v1641_v7, %v72_v48  ;;  %vm93_vm5 = vcmp.lt.s32.totalorder %v1736_v50, 4 }
  0x85   :  { %v85_v61 = vshrl.u32 %v1637_v56, %v73_v51  ;;  %v88_v63 = vshrl.u32 %v1639_v62, %v73_v51  ;;  %v76_v2 = vshrl.u32 %v1640_v1, %v73_v51  ;;  %v223_v5 = vadd.s32 1, %v1404_v58 }
  0x86   :  { %v79_v8 = vshrl.u32 %v1641_v7, %v73_v51  ;;  %v82_v10 = vshrl.u32 %v1636_v54, %v73_v51  ;;  %v74_v14 = vshrl.u32 %v1638_v59, %v73_v51  ;;  %vm90_vm7 = vcmp.lt.s32.totalorder %v1736_v50, 1 }
  0x87   :  { %v86_v11 = vor.u32 %v85_v61, %v84_v55  ;;  %v89_v12 = vor.u32 %v88_v63, %v87_v57  ;;  %v77_v13 = vor.u32 %v76_v2, %v75_v60  ;;  %vm224_vm6 = vcmp.gt.s32.totalorder %v223_v5, 0 }
  0x88   :  { %v80_v15 = vor.u32 %v79_v8, %v78_v3  ;;  %v83_v17 = vor.u32 %v82_v10, %v81_v9  ;;  %v225_v21 = vsel %vm224_vm6, %v223_v5, 0  ;;  %vm92_vm8 = vcmp.lt.s32.totalorder %v1736_v50, 3  ;;  %v721_v10 = vld [vmem:[%s2107_s2 + $0x58] sm:$0xff] }
  0x89   :  { %v99_v18 = vsel %vm93_vm5, %v86_v11, 920167782  ;;  %v103_v19 = vsel %vm93_vm5, %v89_v12, 1326507024  ;;  %v1755_v22 = vand.u32 31, %v225_v21  ;;  %v1762_v29 = vshrl.u32 %v225_v21, 5  ;;  %845 = vperm.xlu1 %1526, %v721_v10  }
  0x8a   :  { %v95_v23 = vsel %vm93_vm5, %v83_v17, 2102212464  ;;  %v98_v24 = vsel %vm90_vm7, %v77_v13, %v80_v15  ;;  %v100_v25 = vsel %vm92_vm8, %v83_v17, %v99_v18  ;;  %v102_v26 = vsel %vm90_vm7, %v80_v15, %v83_v17  ;;  %v711_v10 = vld [vmem:[%s2107_s2 + $0x8] sm:$0xff] }
  0x8b   :  { %v104_v27 = vsel %vm92_vm8, %v86_v11, %v103_v19  ;;  %v1765_v30 = vsub.s32 32, %v1755_v22  ;;  %vm91_vm9 = vcmp.lt.s32.totalorder %v1736_v50, 2  ;;  %v94_v31 = vsel %vm90_vm7, %v74_v14, %v77_v13 }
  0x8c   :  { %v242_v32 = vshll.u32 %v1637_v56, %v1755_v22  ;;  %v96_v33 = vsel %vm92_vm8, %v80_v15, %v95_v23  ;;  %v101_v34 = vsel %vm91_vm9, %v98_v24, %v100_v25  ;;  %v105_v36 = vsel %vm91_vm9, %v102_v26, %v104_v27 }
  0x8d   :  { %v240_v38 = vshrl.u32 %v1637_v56, %v1765_v30  ;;  %v243_v39 = vshrl.u32 %v1639_v62, %v1765_v30  ;;  %v109_v40 = vand.u32 65535, %v105_v36  ;;  %v110_v41 = vshrl.u32 %v105_v36, 16 }
  0x8e   :  { %v131_v45 = vand.u32 65535, %v101_v34  ;;  %v132_v47 = vshrl.u32 %v101_v34, 16  ;;  %v239_v48 = vshll.u32 %v1636_v54, %v1755_v22  ;;  %vm248_vm10 = vcmp.lt.s32.totalorder %v1762_v29, 4 }
  0x8f   :  { %v244_v49 = vor.u32 %v243_v39, %v242_v32  ;;  %v112_v51 = vmul.u32 %v110_v41, %v1739_v52  ;;  %v1785_v55 = vsel %vm91_vm9, %v94_v31, %v96_v33  ;;  %v113_v56 = vmul.u32 %v109_v40, %v108_v43 }
  0x90   :  { %v134_v57 = vmul.u32 %v132_v47, %v1739_v52  ;;  %v221_v58 = vor.u32 8388608, %v1760_v28  ;;  %v241_v60 = vor.u32 %v240_v38, %v239_v48  ;;  %v111_v61 = vmul.u32 %v109_v40, %v1739_v52 }
  0x91   :  { %v114_v62 = vmul.u32 %v110_v41, %v108_v43  ;;  %v115_v63 = vshll.u32 %v112_v51, 16  ;;  %v258_v2 = vsel %vm248_vm10, %v244_v49, 1326507024  ;;  %v116_v3 = vshrl.u32 %v112_v51, 16 }
  0x92   :  { %v133_v5 = vmul.u32 %v131_v45, %v1739_v52  ;;  %v135_v6 = vmul.u32 %v131_v45, %v108_v43  ;;  %v117_v50 = vshll.u32 %v113_v56, 16  ;;  %v137_v9 = vshll.u32 %v134_v57, 16 }
  0x93   :  { %vm119_vm11 = vc.u32 %v111_v61, %v115_v63  ;;  %v121_v8 = vadd.s32 %v115_v63, %v111_v61  ;;  %v118_v11 = vshrl.u32 %v113_v56, 16  ;;  %v136_v13 = vmul.u32 %v132_v47, %v108_v43 }
  0x94   :  { %v120_v12 = vsel %vm119_vm11, 1, %v1635_v0  ;;  %v139_v14 = vshll.u32 %v135_v6, 16  ;;  %vm141_vm13 = vc.u32 %v133_v5, %v137_v9  ;;  %v143_v17 = vadd.s32 %v137_v9, %v133_v5 }
  0x95   :  { %v122_v15 = vadd.s32 %v120_v12, %v114_v62  ;;  %vm123_vm12 = vc.u32 %v121_v8, %v117_v50  ;;  %v142_v18 = vsel %vm141_vm13, 1, %v1635_v0  ;;  %v230_v19 = vshll.u32 %v1638_v59, %v1755_v22  ;;  %v714_v50 = vld [vmem:[%s2107_s2 + $0x20] sm:$0xff] }
  0x96   :  { %v124_v52 = vsel %vm123_vm12, 1, %v1635_v0  ;;  %v231_v21 = vshrl.u32 %v1640_v1, %v1765_v30  ;;  %v138_v24 = vshrl.u32 %v134_v57, 16  ;;  %v144_v25 = vadd.s32 %v142_v18, %v136_v13  ;;  %748 = vperm.xlu2 %1527, %v714_v50  }
  0x97   :  { %v126_v23 = vadd.s32 %v124_v52, %v122_v15  ;;  %vm145_vm14 = vc.u32 %v143_v17, %v139_v14  ;;  %v233_v28 = vshll.u32 %v1640_v1, %v1755_v22  ;;  %v234_v31 = vshrl.u32 %v1641_v7, %v1765_v30 }
  0x98   :  { %v146_v26 = vsel %vm145_vm14, 1, %v1635_v0  ;;  %v1804_v27 = vor.u32 %v231_v21, %v230_v19  ;;  %v236_v34 = vshll.u32 %v1641_v7, %v1755_v22  ;;  %v237_v36 = vshrl.u32 %v1636_v54, %v1765_v30  ;;  %v718_v7 = vld [vmem:[%s2107_s2 + $0x40] sm:$0xff] }
  0x99   :  { %v127_v32 = vadd.s32 %v126_v23, %v116_v3  ;;  %v148_v33 = vadd.s32 %v146_v26, %v144_v25  ;;  %v254_v38 = vsel %vm248_vm10, %v241_v60, 920167782  ;;  %v140_v39 = vshrl.u32 %v135_v6, 16  ;;  %830 = vperm.xlu1 %1526, %v718_v7  }
  0x9a   :  { %v1816_v40 = vor.u32 %v234_v31, %v233_v28  ;;  %vm245_vm15 = vcmp.lt.s32.totalorder %v1762_v29, 1  ;;  %v238_v42 = vor.u32 %v237_v36, %v236_v34  ;;  %vm247_vm0 = vcmp.lt.s32.totalorder %v1762_v29, 3 }
  0x9b   :  { %v1819_v1 = vadd.s32 %v127_v32, %v118_v11  ;;  %v149_v41 = vadd.s32 %v148_v33, %v138_v24  ;;  %v1825_v22 = vadd.s32 %v143_v17, %v139_v14  ;;  %v259_v43 = vsel %vm247_vm0, %v241_v60, %v258_v2 }
  0x9c   :  { %v253_v54 = vsel %vm245_vm15, %v1804_v27, %v1816_v40  ;;  %v1833_v45 = vshll.u32 %v221_v58, 8  ;;  %v151_v48 = vmul.u32 %v1734_v46, %v1785_v55  ;;  %vm246_vm2 = vcmp.lt.s32.totalorder %v1762_v29, 2 }
  0x9d   :  { %v150_v47 = vadd.s32 %v149_v41, %v140_v39  ;;  %vm153_vm1 = vc.u32 %v1819_v1, %v1825_v22  ;;  %v255_v49 = vsel %vm247_vm0, %v238_v42, %v254_v38  ;;  %v257_v51 = vsel %vm245_vm15, %v1816_v40, %v238_v42  ;;  %v715_v41 = vld [vmem:[%s2107_s2 + $0x28] sm:$0xff] }
  0x9e   :  { %v256_v57 = vsel %vm246_vm2, %v253_v54, %v255_v49  ;;  %v260_v46 = vsel %vm246_vm2, %v257_v51, %v259_v43  ;;  %v262_v55 = vand.u32 65535, %v1833_v45  ;;  %v263_v58 = vshrl.u32 %v1833_v45, 16  ;;  %753 = vperm.xlu2 %1527, %v715_v41  }
  0x9f   :  { %v154_v56 = vadd.s32 1, %v150_v47  ;;  %v264_v60 = vand.u32 65535, %v260_v46  ;;  %v265_v61 = vshrl.u32 %v260_v46, 16  ;;  %v286_v62 = vand.u32 65535, %v256_v57 }
  0xa0   :  { %v287_v2 = vshrl.u32 %v256_v57, 16  ;;  %v250_v31 = vsel %vm248_vm10, %v238_v42, 2102212464  ;;  %v229_v7 = vshrl.u32 %v1638_v59, %v1765_v30  ;;  %v152_v29 = vadd.s32 %v1825_v22, %v1819_v1 }
  0xa1   :  { %v155_v63 = vsel %vm153_vm1, %v154_v56, %v150_v47  ;;  %v267_v5 = vmul.u32 %v265_v61, %v262_v55  ;;  %v268_v6 = vmul.u32 %v264_v60, %v263_v58  ;;  %v290_v9 = vmul.u32 %v286_v62, %v263_v58  ;;  %894 = vperm.xlu1 %1526, %v711_v10   ;;  %v726_v47 = vld [vmem:[%s2107_s2 + $0x80] sm:$0xff] }
  0xa2   :  { %v156_v3 = vadd.s32 %v155_v63, %v151_v48  ;;  %v289_v8 = vmul.u32 %v287_v2, %v262_v55  ;;  %v266_v12 = vmul.u32 %v264_v60, %v262_v55  ;;  %v269_v14 = vmul.u32 %v265_v61, %v263_v58 }
  0xa3   :  { %v270_v13 = vshll.u32 %v267_v5, 16  ;;  %v288_v15 = vmul.u32 %v286_v62, %v262_v55  ;;  %v272_v18 = vshll.u32 %v268_v6, 16  ;;  %v294_v23 = vshll.u32 %v290_v9, 16  ;;  %v712_v62 = vld [vmem:[%s2107_s2 + $0x10] sm:$0xff] }
  0xa4   :  { %v157_v11 = vadd.s32 536870912, %v156_v3  ;;  %v292_v17 = vshll.u32 %v289_v8, 16  ;;  %v291_v28 = vmul.u32 %v287_v2, %v263_v58  ;;  %v271_v36 = vshrl.u32 %v267_v5, 16  ;;  %v725_v2 = vld [vmem:[%s2107_s2 + $0x78] sm:$0xff] }
  0xa5   :  { %vm274_vm4 = vc.u32 %v266_v12, %v270_v13  ;;  %v276_v19 = vadd.s32 %v270_v13, %v266_v12  ;;  %v273_v54 = vshrl.u32 %v268_v6, 16  ;;  %v293_v43 = vshrl.u32 %v289_v8, 16 }
  0xa6   :  { %v1857_v52 = vshrl.u32 %v157_v11, 30  ;;  %v275_v21 = vsel %vm274_vm4, 1, %v1635_v0  ;;  %vm296_vm5 = vc.u32 %v288_v15, %v292_v17  ;;  %v298_v24 = vadd.s32 %v292_v17, %v288_v15  ;;  %899 = vperm.xlu2 %1527, %v712_v62  }
  0xa7   :  { %v277_v26 = vadd.s32 %v275_v21, %v269_v14  ;;  %vm278_vm6 = vc.u32 %v276_v19, %v272_v18  ;;  %v297_v33 = vsel %vm296_vm5, 1, %v1635_v0  ;;  %v249_v56 = vsel %vm245_vm15, %v229_v7, %v1804_v27 }
  0xa8   :  { %v159_v25 = vshll.u32 %v1857_v52, 30  ;;  %v279_v32 = vsel %vm278_vm6, 1, %v1635_v0  ;;  %vm300_vm7 = vc.u32 %v298_v24, %v294_v23  ;;  %v299_v39 = vadd.s32 %v297_v33, %v291_v28 }
  0xa9   :  { %v281_v38 = vadd.s32 %v279_v32, %v277_v26  ;;  %v301_v42 = vsel %vm300_vm7, 1, %v1635_v0  ;;  %v251_v59 = vsel %vm247_vm0, %v1816_v40, %v250_v31  ;;  %v295_v0 = vshrl.u32 %v290_v9, 16  ;;  %971 = vperm.xlu1 %1526, %v726_v47  }
  0xaa   :  { %v160_v34 = vsub.s32 %v156_v3, %v159_v25  ;;  %v303_v51 = vadd.s32 %v301_v42, %v299_v39  ;;  %v302_v58 = vadd.s32 %v298_v24, %v294_v23  ;;  %v252_v60 = vsel %vm246_vm2, %v249_v56, %v251_v59  ;;  %v736_v59 = vld [vmem:[%s2107_s2 + $0xd0] sm:$0xff] }
  0xab   :  { %v282_v49 = vadd.s32 %v281_v38, %v271_v36  ;;  %v306_v40 = vmul.u32 %v1833_v45, %v252_v60  ;;  %v719_v45 = vld [vmem:[%s2107_s2 + $0x48] sm:$0xff]  ;;  %vm60_vm12 = vcmp.lt.s32.totalorder %v1725_v35, 0  ;;  %vm1897_vm13 = vcmp.le.f32.partialorder %v58_v37, 0.7853982 }
  0xac   :  { %vm161_vm8 = vcmp.lt.s32.totalorder %v160_v34, 0  ;;  %v162_v48 = vsub.s32 0, %v160_v34  ;;  %v304_v46 = vadd.s32 %v303_v51, %v293_v43  ;;  %v182_v62 = vsub.s32 4, %v1857_v52 }
  0xad   :  { %v283_v57 = vadd.s32 %v282_v49, %v273_v54  ;;  %vm215_vm15 = vcmp.lt.s32.totalorder %v1731_v44, 0  ;;  %vm1916_vm0 = vcmp.le.f32.partialorder %v213_v53, 0.7853982  ;;  %vm201_vm1 = vweird.f32 %v1725_v35 }
  0xae   :  { %v163_v30 = vsel %vm161_vm8, %v162_v48, %v160_v34  ;;  %v305_v61 = vadd.s32 %v304_v46, %v295_v0  ;;  %835 = vperm.xlu2 %1527, %v719_v45   ;;  %v183_v53 = vsel %vm60_vm12, %v182_v62, %v1857_v52  ;;  %v730_v52 = vld [vmem:[%s2107_s2 + $0xa0] sm:$0xff] }
  0xaf   :  { %v164_v55 = vclz %v163_v30  ;;  %vm308_vm9 = vc.u32 %v283_v57, %v302_v58  ;;  %v307_v39 = vadd.s32 %v302_v58, %v283_v57  ;;  %v728_v58 = vld [vmem:[%s2107_s2 + $0x90] sm:$0xff] }
  0xb0   :  { %v309_v63 = vadd.s32 1, %v305_v61 }
  0xb1   :  { %v1402_v27 = vadd.s32 4294967294, %v164_v55  ;;  %966 = vperm.xlu1 %1526, %v725_v2  }
  0xb2   :  { %v310_v5 = vsel %vm308_vm9, %v309_v63, %v305_v61 }
  0xb3   :  { %vm1403_vm10 = vcmp.lt.s32.totalorder %v1402_v27, 0  ;;  %v311_v8 = vadd.s32 %v310_v5, %v306_v40 }
  0xb4   :  { %v167_v3 = vsel %vm1403_vm10, 0, %v1402_v27 }
  0xb5   :  { %v168_v6 = vsub.s32 32, %v167_v3  ;;  %v172_v50 = vsub.s32 4294967266, %v167_v3  ;;  %v169_v9 = vshll.u32 %v160_v34, %v167_v3  ;;  %v312_v12 = vadd.s32 536870912, %v311_v8  ;;  %v735_v3 = vld [vmem:[%s2107_s2 + $0xc8] sm:$0xff] }
  0xb6   :  { %981 = vperm.xlu2 %1527, %v728_v58  }
  0xb7   :  { %v170_v10 = vshrl.u32 %v152_v29, %v168_v6  ;;  %v173_v11 = vadd.s32 127, %v172_v50  ;;  %v313_v15 = vshrl.u32 %v312_v12, 30  ;;  %v727_v50 = vld [vmem:[%s2107_s2 + $0x88] sm:$0xff]  ;;  %v185_v12 = vsel %vm1897_vm13, 0, %v183_v53 }
  0xb9   :  { %v171_v13 = vor.u32 %v170_v10, %v169_v9  ;;  %v174_v14 = vshll.u32 %v173_v11, 23  ;;  %v314_v18 = vshll.u32 %v313_v15, 30  ;;  %1134 = vperm.xlu1 %1526, %v736_v59   ;;  %v337_v2 = vsub.s32 4, %v313_v15 }
  0xbb   :  { %v175_v17 = vor.u32 4788187, %v174_v14  ;;  %v178_v1 = vcvt.s32.f32 %v171_v13  ;;  %v315_v22 = vsub.s32 %v311_v8, %v314_v18  ;;  %v338_v9 = vsel %vm215_vm15, %v337_v2, %v313_v15  ;;  %v732_v2 = vld [vmem:[%s2107_s2 + $0xb0] sm:$0xff] }
  0xbc   :  { %v202_v15 = vadd.s32 3, %v185_v12 }
  0xbd   :  { %v176_v19 = vand.u32 2147483647, %v175_v17  ;;  %vm316_vm11 = vcmp.lt.s32.totalorder %v315_v22, 0  ;;  %v317_v23 = vsub.s32 0, %v315_v22  ;;  %v340_v17 = vsel %vm1916_vm0, 0, %v338_v9 }
  0xbe   :  { %976 = vperm.xlu2 %1527, %v727_v50  }
  0xbf   :  { %v179_v21 = vmul.f32 %v178_v1, %v176_v19  ;;  %v318_v25 = vsel %vm316_vm11, %v317_v23, %v315_v22 }
  0xc0   :  { %v319_v26 = vclz %v318_v25  ;;  %v512_v25 = vand.u32 3, %v185_v12 }
  0xc1   :  { %v180_v24 = vxor.u32 2147483648, %v179_v21  ;;  %1129 = vperm.xlu1 %1526, %v735_v3   ;;  %v1500_v3 = vld [vmem:[%s2109_s1 + $0x10] sm:$0xff] }
  0xc2   :  { %v1405_v33 = vadd.s32 4294967294, %v319_v26  ;;  %v722_v26 = vld [vmem:[%s2107_s2 + $0x60] sm:$0xff]  ;;  %vm514_vm2 = vcmp.eq.s32.totalorder %v512_v25, 0  ;;  %vm513_vm4 = vcmp.lt.s32.totalorder %v512_v25, 2  ;;  %vm517_vm5 = vcmp.eq.s32.totalorder %v512_v25, 2 }
  0xc3   :  { %v181_v31 = vsel %vm60_vm12, %v180_v24, %v179_v21  ;;  %v357_v24 = vadd.s32 3, %v340_v17 }
  0xc4   :  { %v184_v32 = vsel %vm1897_vm13, %v1725_v35, %v181_v31  ;;  %vm1406_vm14 = vcmp.lt.s32.totalorder %v1405_v33, 0  ;;  %vm356_vm13 = vweird.f32 %v1731_v44  ;;  %v731_v35 = vld [vmem:[%s2107_s2 + $0xa8] sm:$0xff] }
  0xc5   :  { %v186_v34 = vmul.f32 %v184_v32, %v184_v32  ;;  %v322_v38 = vsel %vm1406_vm14, 0, %v1405_v33 }
  0xc6   :  { %v323_v41 = vsub.s32 32, %v322_v38  ;;  %v327_v7 = vsub.s32 4294967266, %v322_v38  ;;  %v324_v37 = vshll.u32 %v315_v22, %v322_v38  ;;  %951 = vperm.xlu2 %1527, %v722_v26  }
  0xc7   :  { %v194_v36 = vmul.f32 -0.00019511016, %v186_v34  ;;  %v187_v47 = vmul.f32 -0.001358992, %v186_v34 }
  0xc8   :  { %v325_v43 = vshrl.u32 %v307_v39, %v323_v41  ;;  %v328_v42 = vadd.s32 127, %v327_v7  ;;  %v358_v41 = vand.u32 3, %v357_v24 }
  0xc9   :  { %v195_v54 = vadd.f32 0.008332121, %v194_v36  ;;  %v188_v30 = vadd.f32 0.041655596, %v187_v47  ;;  %1104 = vperm.xlu1 %1526, %v730_v52   ;;  %v203_v36 = vand.u32 3, %v202_v15 }
  0xca   :  { %v326_v48 = vor.u32 %v325_v43, %v324_v37  ;;  %v329_v49 = vshll.u32 %v328_v42, 23  ;;  %v741_v43 = vld [vmem:[%s2107_s2 + $0xf8] sm:$0xff]  ;;  %vm359_vm10 = vcmp.lt.s32.totalorder %v358_v41, 2  ;;  %vm360_vm11 = vcmp.eq.s32.totalorder %v358_v41, 0 }
  0xcb   :  { %v196_v51 = vmul.f32 %v195_v54, %v186_v34  ;;  %v189_v60 = vmul.f32 %v188_v30, %v186_v34  ;;  %vm205_vm8 = vcmp.eq.s32.totalorder %v203_v36, 0  ;;  %vm363_vm12 = vcmp.eq.s32.totalorder %v358_v41, 2 }
  0xcc   :  { %v330_v56 = vor.u32 4788187, %v329_v49  ;;  %v333_v46 = vcvt.s32.f32 %v326_v48  ;;  %vm208_vm14 = vcmp.eq.s32.totalorder %v203_v36, 2 }
  0xcd   :  { %v197_v57 = vadd.f32 -0.16666654, %v196_v51  ;;  %v190_v29 = vadd.f32 -0.4999988, %v189_v60  ;;  %v737_v51 = vld [vmem:[%s2107_s2 + $0xd8] sm:$0xff] }
  0xce   :  { %v331_v0 = vand.u32 2147483647, %v330_v56  ;;  %1139 = vperm.xlu2 %1527, %v737_v51   ;;  %v1503_v51 = vld [vmem:[%s2109_s1 + $0x28] sm:$0xff] }
  0xcf   :  { %v198_v27 = vmul.f32 %v197_v57, %v186_v34  ;;  %v191_v45 = vmul.f32 %v190_v29, %v186_v34  ;;  %v666_v34 = vand.u32 3, %v340_v17  ;;  %v1501_v29 = vld [vmem:[%s2109_s1 + $0x18] sm:$0xff] }
  0xd0   :  { %v334_v55 = vmul.f32 %v333_v46, %v331_v0 }
  0xd1   :  { %v199_v8 = vadd.f32 1.0, %v198_v27  ;;  %v192_v22 = vadd.f32 1.0, %v191_v45  ;;  %vm667_vm6 = vcmp.lt.s32.totalorder %v666_v34, 2  ;;  %vm668_vm7 = vcmp.eq.s32.totalorder %v666_v34, 0  ;;  %1273 = vperm.xlu1 %1526, %v741_v43   ;;  %v742_v27 = vld [vmem:[%s2107_s2 + $0x100] sm:$0xff] }
  0xd2   :  { %v335_v61 = vxor.u32 2147483648, %v334_v55  ;;  %vm671_vm9 = vcmp.eq.s32.totalorder %v666_v34, 2 }
  0xd3   :  { %v200_v18 = vmul.f32 %v199_v8, %v184_v32  ;;  %v209_v38 = vxor.u32 2147483648, %v192_v22 }
  0xd4   :  { %v336_v40 = vsel %vm215_vm15, %v335_v61, %v334_v55  ;;  %vm204_vm15 = vcmp.lt.s32.totalorder %v203_v36, 2 }
  0xd5   :  { %v339_v5 = vsel %vm1916_vm0, %v1731_v44, %v336_v40  ;;  %v206_v28 = vxor.u32 2147483648, %v200_v18  ;;  %v519_v47 = vsel %vm517_vm5, %v209_v38, %v200_v18  ;;  %v210_v60 = vsel %vm208_vm14, %v209_v38, %v200_v18 }
  0xd6   :  { %v341_v6 = vmul.f32 %v339_v5, %v339_v5  ;;  %vm776_vm0 = vcmask 261120   ;;  %1114 = vperm.xlu2 %1527, %v732_v2  }
  0xd7   :  { %v516_v37 = vsel %vm514_vm2, %v192_v22, %v206_v28  ;;  %v207_v49 = vsel %vm205_vm8, %v192_v22, %v206_v28 }
  0xd8   :  { %v342_v10 = vmul.f32 -0.001358992, %v341_v6  ;;  %v349_v11 = vmul.f32 -0.00019511016, %v341_v6  ;;  %v520_v48 = vsel %vm513_vm4, %v516_v37, %v519_v47  ;;  %v211_v62 = vsel %vm204_vm15, %v207_v49, %v210_v60  ;;  %v1502_v49 = vld [vmem:[%s2109_s1 + $0x20] sm:$0xff] }
  0xd9   :  { %v521_v55 = vsel %vm201_vm1, nan, %v520_v48  ;;  %v212_v44 = vsel %vm201_vm1, nan, %v211_v62  ;;  %1339 = vperm.xlu1 %1526, %v742_v27  }
  0xda   :  { %v343_v13 = vadd.f32 0.041655596, %v342_v10  ;;  %v350_v14 = vadd.f32 0.008332121, %v349_v11  ;;  %v759_v10 = vpop.permute.xlu1 %758 }
  0xdc   :  { %v344_v19 = vmul.f32 %v343_v13, %v341_v6  ;;  %v351_v1 = vmul.f32 %v350_v14, %v341_v6 }
  0xde   :  { %v345_v21 = vadd.f32 -0.4999988, %v344_v19  ;;  %v352_v23 = vadd.f32 -0.16666654, %v351_v1  ;;  %1109 = vperm.xlu2 %1527, %v731_v35  }
  0xe0   :  { %v346_v31 = vmul.f32 %v345_v21, %v341_v6  ;;  %v353_v33 = vmul.f32 %v352_v23, %v341_v6  ;;  %v743_v6 = vld [vmem:[%s2107_s2 + $0x108] sm:$0xff] }
  0xe2   :  { %v347_v32 = vadd.f32 1.0, %v346_v31  ;;  %v354_v39 = vadd.f32 1.0, %v353_v33 }
  0xe4   :  { %v355_v7 = vmul.f32 %v354_v39, %v339_v5  ;;  %v364_v54 = vxor.u32 2147483648, %v347_v32  ;;  %v738_v5 = vld [vmem:[%s2107_s2 + $0xe0] sm:$0xff] }
  0xe6   :  { %v361_v42 = vxor.u32 2147483648, %v355_v7  ;;  %v673_v59 = vsel %vm671_vm9, %v364_v54, %v355_v7  ;;  %v365_v0 = vsel %vm363_vm12, %v364_v54, %v355_v7  ;;  %1258 = vperm.xlu2 %1527, %v738_v5  }
  0xe8   :  { %v670_v56 = vsel %vm668_vm7, %v347_v32, %v361_v42  ;;  %v362_v30 = vsel %vm360_vm11, %v347_v32, %v361_v42 }
  0xe9   :  { %v674_v46 = vsel %vm667_vm6, %v670_v56, %v673_v59  ;;  %v366_v57 = vsel %vm359_vm10, %v362_v30, %v365_v0  ;;  %v1498_v56 = vld [vmem:[%s2109_s1] sm:$0xff]  ;;  %v938_v0 = vpop.f32.mrf.mxu2 }
  0xea   :  { %v675_v58 = vsel %vm356_vm13, nan, %v674_v46  ;;  %v367_v63 = vsel %vm356_vm13, nan, %v366_v57  ;;  %v841_v46 = vpop.permute.xlu0 %840 }
  0xeb   :  { %v745_v61 = vpack.c.bf16 %v675_v58, %v521_v55  ;;  %v744_v40 = vpack.c.bf16 %v367_v63, %v212_v44 }
  0xed   :  { %789 = vmatpush.bf16.msra.mxu0 %v745_v61 }
  0xee   :  { %1344 = vperm.xlu2 %1527, %v743_v6  }
  0xf0   :  { %v749_v50 = vpop.permute.xlu2 %748  ;;  %v764_v1 = vpop.permute.xlu1 %763 }
  0xf1   :  { %790 = vmatpush.bf16.msra.mxu0 %v744_v40  ;;  %v940_v55 = vpop.f32.mrf.mxu2 }
  0xf2   :  { %v905_v58 = vpop.permute.xlu0 %904 }
  0xf3   :  { %v941_v27 = vadd.f32 %v940_v55, %v905_v58 }
  0xf4   :  { %1421 = vmatmul.msk.bf16.vlgmr.msra.gmra.mxu0 %vm776_vm0, %v1500_v3 }
  0xf8   :  { %v754_v9 = vpop.permute.xlu2 %753 }
 0x100   :  { %v900_v61 = vpop.permute.xlu2 %899 }
 0x101   :  { %v939_v63 = vadd.f32 %v938_v0, %v900_v61 }
 0x104   :  { %1422 = vmatmul.msk.bf16.gmra.mxu0 %vm776_vm0, %v1501_v29  ;;  %v890_v29 = vpop.permute.xlu0 %889 }
 0x108   :  { %v836_v6 = vpop.permute.xlu2 %835 }
 0x171   :  { %v792_v53 = vpop.f32.mrf.mxu0 }
 0x172   :  { %v793_v45 = vadd.f32 %v792_v53, %v749_v50 }
 0x174   :  { %v802_v52 = vsub.f32 0.0, %v793_v45 }
 0x176   :  { %v806_v22 = vmul.f32 1.442695, %v802_v52  ;;  %v1506_v52 = vld [vmem:[%s2109_s1 + $0x40] sm:$0xff] }
 0x179   :  { %v794_v8 = vpop.f32.mrf.mxu0 }
 0x17a   :  { %v795_v11 = vadd.f32 %v794_v8, %v754_v9 }
 0x17c   :  { %v803_v14 = vsub.f32 0.0, %v795_v11 }
 0x17e   :  { %v808_v19 = vmul.f32 1.442695, %v803_v14  ;;  %v1504_v14 = vld [vmem:[%s2109_s1 + $0x30] sm:$0xff] }
 0x181   :  { %v797_v12 = vpop.f32.mrf.mxu0 }
 0x182   :  { %v798_v13 = vadd.f32 %v797_v12, %v759_v10 }
 0x184   :  { %v804_v17 = vsub.f32 0.0, %v798_v13 }
 0x186   :  { %v810_v18 = vmul.f32 1.442695, %v804_v17  ;;  %v1505_v17 = vld [vmem:[%s2109_s1 + $0x38] sm:$0xff] }
 0x188   :  { %1532 = vpow2.f32 %v810_v18  ;;  %v1507_v18 = vld [vmem:[%s2109_s1 + $0x48] sm:$0xff] }
 0x189   :  { %v799_v15 = vpop.f32.mrf.mxu0  ;;  %1534 = vpow2.f32 %v808_v19 }
 0x18a   :  { %v800_v21 = vadd.f32 %v799_v15, %v764_v1  ;;  %1536 = vpow2.f32 %v806_v22 }
 0x18c   :  { %v805_v23 = vsub.f32 0.0, %v800_v21 }
 0x18e   :  { %v812_v24 = vmul.f32 1.442695, %v805_v23  ;;  %v1533_v25 = vpop.eup %1532  ;;  %v987_v23 = vpop.permute.xlu0 %986 }
 0x18f   :  { %v1535_v26 = vpop.eup %1534  ;;  %v816_v28 = vadd.f32 1.0, %v1533_v25 }
 0x190   :  { %1538 = vpow2.f32 %v812_v24  ;;  %v1537_v31 = vpop.eup %1536  ;;  %v815_v33 = vadd.f32 1.0, %v1535_v26  ;;  %v982_v24 = vpop.permute.xlu2 %981 }
 0x191   :  { %v814_v36 = vadd.f32 1.0, %v1537_v31  ;;  %1540 = vrcp.f32 %v816_v28 }
 0x192   :  { %1542 = vrcp.f32 %v815_v33 }
 0x196   :  { %v1539_v34 = vpop.eup %1538  ;;  %v962_v28 = vpop.permute.xlu0 %961 }
 0x197   :  { %v817_v38 = vadd.f32 1.0, %v1539_v34  ;;  %v1541_v32 = vpop.eup %1540 }
 0x198   :  { %v1543_v39 = vpop.eup %1542  ;;  %v824_v7 = vmul.f32 %v1541_v32, %v798_v13  ;;  %v977_v31 = vpop.permute.xlu2 %976 }
 0x199   :  { %1544 = vrcp.f32 %v817_v38  ;;  %v823_v43 = vmul.f32 %v1543_v39, %v795_v11 }
 0x19a   :  { %1546 = vrcp.f32 %v814_v36 }
 0x19f   :  { %v1545_v41 = vpop.eup %1544 }
 0x1a0   :  { %v825_v54 = vmul.f32 %v1545_v41, %v800_v21  ;;  %v1547_v37 = vpop.eup %1546 }
 0x1a1   :  { %v822_v47 = vmul.f32 %v1547_v37, %v793_v45 }
 0x1a2   :  { %v827_v42 = vpack.c.bf16 %v825_v54, %v824_v7 }
 0x1a3   :  { %v826_v48 = vpack.c.bf16 %v823_v43, %v822_v47 }
 0x1a4   :  { %870 = vmatpush.bf16.msra.mxu1 %v827_v42  ;;  %v957_v42 = vpop.permute.xlu0 %956 }
 0x1a8   :  { %871 = vmatpush.bf16.msra.mxu1 %v826_v48 }
 0x1ab   :  { %1431 = vmatmul.msk.bf16.vlgmr.msra.gmra.mxu1 %vm776_vm0, %v1502_v49  ;;  %v952_v49 = vpop.permute.xlu2 %951 }
 0x1ac   :  { %931 = vmatpush.bf16.msrb.mxu1 %v1694_v20  ;;  %v846_v20 = vpop.permute.xlu1 %845 }
 0x1b4   :  { %v831_v35 = vpop.permute.xlu1 %830 }
 0x1bb   :  { %1432 = vmatmul.msk.bf16.gmra.mxu1 %vm776_vm0, %v1503_v51 }
 0x1bc   :  { %v895_v50 = vpop.permute.xlu1 %894 }
 0x1c4   :  { %v972_v25 = vpop.permute.xlu1 %971 }
 0x1cb   :  { %1441 = vmatmul.msk.bf16.vlgmr.msrb.gmra.mxu1 %vm917_vm3, %v1498_v56  ;;  %vm1162_vm3 = vcmask 523264  }
 0x1cc   :  { %v967_v36 = vpop.permute.xlu1 %966 }
 0x228   :  { %v873_v59 = vpop.f32.mrf.mxu1 }
 0x229   :  { %v874_v9 = vadd.f32 %v873_v59, %v831_v35 }
 0x230   :  { %v875_v30 = vpop.f32.mrf.mxu1 }
 0x231   :  { %v876_v10 = vadd.f32 %v875_v30, %v836_v6 }
 0x238   :  { %v878_v57 = vpop.f32.mrf.mxu1 }
 0x239   :  { %v879_v60 = vadd.f32 %v878_v57, %v841_v46 }
 0x23b   :  { %v945_v40 = vadd.f32 %v939_v63, %v879_v60 }
 0x240   :  { %v880_v62 = vpop.f32.mrf.mxu1 }
 0x241   :  { %v881_v44 = vadd.f32 %v880_v62, %v846_v20 }
 0x243   :  { %v946_v2 = vadd.f32 %v941_v27, %v881_v44 }
 0x245   :  { %v948_v3 = vpack.c.bf16 %v946_v2, %v945_v40 }
 0x247   :  { %1027 = vmatpush.bf16.msra.mxu3 %v948_v3 }
 0x248   :  { %v933_v5 = vpop.f32.mrf.mxu1 }
 0x249   :  { %v934_v53 = vadd.f32 %v933_v5, %v890_v29 }
 0x24b   :  { %v943_v12 = vadd.f32 %v934_v53, %v874_v9 }
 0x250   :  { %v935_v8 = vpop.f32.mrf.mxu1 }
 0x251   :  { %v936_v11 = vadd.f32 %v935_v8, %v895_v50 }
 0x253   :  { %v944_v45 = vadd.f32 %v936_v11, %v876_v10 }
 0x255   :  { %v947_v13 = vpack.c.bf16 %v944_v45, %v943_v12 }
 0x257   :  { %1028 = vmatpush.bf16.msra.mxu3 %v947_v13 }
 0x25a   :  { %1459 = vmatmul.msk.bf16.vlgmr.msra.gmra.mxu3 %vm776_vm0, %v1504_v14 }
 0x26a   :  { %1460 = vmatmul.msk.bf16.gmra.mxu3 %vm776_vm0, %v1505_v17 }
 0x27a   :  { %1461 = vmatmul.msk.bf16.gmra.mxu3 %vm776_vm0, %v1506_v52 }
 0x28a   :  { %1462 = vmatmul.msk.bf16.gmra.mxu3 %vm776_vm0, %v1507_v18 }
 0x2dd   :  { %v1030_v19 = vpop.f32.mrf.mxu3 }
 0x2de   :  { %v2020_v56 = vadd.f32 %v1030_v19, %v952_v49  ;;  %v1125_v49 = vpop.permute.xlu0 %1124 }
 0x2e0   :  { %v1050_v58 = vsub.f32 0.0, %v2020_v56 }
 0x2e2   :  { %v1058_v44 = vmul.f32 1.442695, %v1050_v58 }
 0x2e5   :  { %v1032_v1 = vpop.f32.mrf.mxu3 }
 0x2e6   :  { %v2018_v51 = vadd.f32 %v1032_v1, %v957_v42 }
 0x2e8   :  { %v1051_v20 = vsub.f32 0.0, %v2018_v51 }
 0x2ea   :  { %v1060_v27 = vmul.f32 1.442695, %v1051_v20 }
 0x2ed   :  { %v1035_v15 = vpop.f32.mrf.mxu3 }
 0x2ee   :  { %v2014_v54 = vadd.f32 %v1035_v15, %v962_v28 }
 0x2f0   :  { %v1052_v30 = vsub.f32 0.0, %v2014_v54 }
 0x2f2   :  { %v1062_v60 = vmul.f32 1.442695, %v1052_v30 }
 0x2f5   :  { %v1037_v22 = vpop.f32.mrf.mxu3 }
 0x2f6   :  { %v2011_v39 = vadd.f32 %v1037_v22, %v967_v36 }
 0x2f8   :  { %v1053_v47 = vsub.f32 0.0, %v2011_v39 }
 0x2fa   :  { %v1064_v57 = vmul.f32 1.442695, %v1053_v47  ;;  %v1140_v47 = vpop.permute.xlu2 %1139 }
 0x2fd   :  { %v1040_v21 = vpop.f32.mrf.mxu3 }
 0x2fe   :  { %v2009_v38 = vadd.f32 %v1040_v21, %v972_v25 }
 0x300   :  { %v1054_v37 = vsub.f32 0.0, %v2009_v38 }
 0x302   :  { %v1066_v0 = vmul.f32 1.442695, %v1054_v37 }
 0x305   :  { %v1042_v26 = vpop.f32.mrf.mxu3 }
 0x306   :  { %v2007_v33 = vadd.f32 %v1042_v26, %v977_v31 }
 0x308   :  { %v1055_v41 = vsub.f32 0.0, %v2007_v33 }
 0x30a   :  { %v1068_v48 = vmul.f32 1.442695, %v1055_v41  ;;  %v1511_v41 = vld [vmem:[%s2109_s1 + $0x68] sm:$0xff] }
 0x30d   :  { %v1045_v34 = vpop.f32.mrf.mxu3 }
 0x30e   :  { %v1046_v32 = vadd.f32 %v1045_v34, %v982_v24 }
 0x310   :  { %v1056_v7 = vsub.f32 0.0, %v1046_v32 }
 0x312   :  { %v1070_v43 = vmul.f32 1.442695, %v1056_v7 }
 0x314   :  { %1548 = vpow2.f32 %v1070_v43 }
 0x315   :  { %v1047_v59 = vpop.f32.mrf.mxu3  ;;  %1550 = vpow2.f32 %v1068_v48  ;;  %v1135_v48 = vpop.permute.xlu1 %1134 }
 0x316   :  { %v1048_v46 = vadd.f32 %v1047_v59, %v987_v23  ;;  %1552 = vpow2.f32 %v1066_v0 }
 0x317   :  { %1554 = vpow2.f32 %v1064_v57 }
 0x318   :  { %v1057_v55 = vsub.f32 0.0, %v1048_v46 }
 0x31a   :  { %v1072_v61 = vmul.f32 1.442695, %v1057_v55  ;;  %v1549_v62 = vpop.eup %1548 }
 0x31b   :  { %v1551_v63 = vpop.eup %1550  ;;  %v1080_v40 = vadd.f32 1.0, %v1549_v62 }
 0x31c   :  { %1556 = vpow2.f32 %v1072_v61  ;;  %v1553_v2 = vpop.eup %1552  ;;  %v1079_v3 = vadd.f32 1.0, %v1551_v63 }
 0x31d   :  { %1558 = vpow2.f32 %v1062_v60  ;;  %v1555_v35 = vpop.eup %1554  ;;  %v1078_v29 = vadd.f32 1.0, %v1553_v2  ;;  %v1130_v59 = vpop.permute.xlu1 %1129 }
 0x31e   :  { %1560 = vpow2.f32 %v1060_v27  ;;  %v1077_v50 = vadd.f32 1.0, %v1555_v35 }
 0x31f   :  { %1562 = vpow2.f32 %v1058_v44 }
 0x320   :  { %1564 = vrcp.f32 %v1080_v40 }
 0x321   :  { %1566 = vrcp.f32 %v1079_v3 }
 0x322   :  { %v1557_v5 = vpop.eup %1556 }
 0x323   :  { %v1081_v6 = vadd.f32 1.0, %v1557_v5  ;;  %v1559_v53 = vpop.eup %1558 }
 0x324   :  { %v1561_v8 = vpop.eup %1560  ;;  %v1076_v9 = vadd.f32 1.0, %v1559_v53 }
 0x325   :  { %1568 = vrcp.f32 %v1081_v6  ;;  %v1563_v10 = vpop.eup %1562  ;;  %v1075_v12 = vadd.f32 1.0, %v1561_v8  ;;  %v1105_v2 = vpop.permute.xlu1 %1104 }
 0x326   :  { %1570 = vrcp.f32 %v1078_v29  ;;  %v1565_v11 = vpop.eup %1564  ;;  %v1074_v14 = vadd.f32 1.0, %v1563_v10 }
 0x327   :  { %1572 = vrcp.f32 %v1077_v50  ;;  %v1567_v45 = vpop.eup %1566  ;;  %v1096_v17 = vmul.f32 %v1565_v11, %v1046_v32  ;;  %v1509_v32 = vld [vmem:[%s2109_s1 + $0x58] sm:$0xff] }
 0x328   :  { %1574 = vrcp.f32 %v1076_v9  ;;  %v1095_v19 = vmul.f32 %v1567_v45, %v2007_v33 }
 0x329   :  { %1576 = vrcp.f32 %v1075_v12 }
 0x32a   :  { %1578 = vrcp.f32 %v1074_v14 }
 0x32b   :  { %v1569_v13 = vpop.eup %1568 }
 0x32c   :  { %v1097_v52 = vmul.f32 %v1569_v13, %v1048_v46  ;;  %v1571_v18 = vpop.eup %1570  ;;  %v1120_v46 = vpop.permute.xlu0 %1119 }
 0x32d   :  { %v1573_v15 = vpop.eup %1572  ;;  %v1094_v22 = vmul.f32 %v1571_v18, %v2009_v38  ;;  %v1508_v38 = vld [vmem:[%s2109_s1 + $0x50] sm:$0xff] }
 0x32e   :  { %v1101_v1 = vpack.c.bf16 %v1097_v52, %v1096_v17  ;;  %v1575_v21 = vpop.eup %1574  ;;  %v1093_v23 = vmul.f32 %v1573_v15, %v2011_v39  ;;  %v1510_v39 = vld [vmem:[%s2109_s1 + $0x60] sm:$0xff] }
 0x32f   :  { %v1100_v24 = vpack.c.bf16 %v1095_v19, %v1094_v22  ;;  %v1577_v25 = vpop.eup %1576  ;;  %v1092_v26 = vmul.f32 %v1575_v21, %v2014_v54 }
 0x330   :  { %1179 = vmatpush.bf16.msrb.mxu2 %v1101_v1  ;;  %v1579_v28 = vpop.eup %1578  ;;  %v1091_v31 = vmul.f32 %v1577_v25, %v2018_v51 }
 0x331   :  { %v1099_v34 = vpack.c.bf16 %v1093_v23, %v1092_v26  ;;  %v1090_v33 = vmul.f32 %v1579_v28, %v2020_v56  ;;  %v1115_v56 = vpop.permute.xlu2 %1114 }
 0x333   :  { %v1098_v36 = vpack.c.bf16 %v1091_v31, %v1090_v33 }
 0x334   :  { %1180 = vmatpush.bf16.msrb.mxu2 %v1100_v24 }
 0x338   :  { %1181 = vmatpush.bf16.msrb.mxu2 %v1099_v34 }
 0x339   :  { %v1110_v63 = vpop.permute.xlu2 %1109 }
 0x33c   :  { %1182 = vmatpush.bf16.msrb.mxu2 %v1098_v36 }
 0x33f   :  { %1479 = vmatmul.msk.bf16.vlgmr.msrb.gmra.mxu2 %vm1162_vm3, %v1508_v38 }
 0x34f   :  { %1480 = vmatmul.msk.bf16.gmra.mxu2 %vm1162_vm3, %v1509_v32 }
 0x35f   :  { %1481 = vmatmul.msk.bf16.gmra.mxu2 %vm1162_vm3, %v1510_v39 }
 0x36f   :  { %1482 = vmatmul.msk.bf16.gmra.mxu2 %vm1162_vm3, %v1511_v41 }
 0x3c2   :  { %v1184_v7 = vpop.f32.mrf.mxu2 }
 0x3c3   :  { %v2060_v35 = vadd.f32 %v1184_v7, %v1105_v2 }
 0x3c5   :  { %v1204_v10 = vsub.f32 0.0, %v2060_v35 }
 0x3c7   :  { %v1212_v17 = vmul.f32 1.442695, %v1204_v10 }
 0x3ca   :  { %v1186_v54 = vpop.f32.mrf.mxu2 }
 0x3cb   :  { %v2058_v3 = vadd.f32 %v1186_v54, %v1110_v63 }
 0x3cd   :  { %v1205_v8 = vsub.f32 0.0, %v2058_v3 }
 0x3cf   :  { %v1214_v13 = vmul.f32 1.442695, %v1205_v8 }
 0x3d2   :  { %v1189_v37 = vpop.f32.mrf.mxu2 }
 0x3d3   :  { %v2054_v61 = vadd.f32 %v1189_v37, %v1115_v56 }
 0x3d5   :  { %v1206_v29 = vsub.f32 0.0, %v2054_v61 }
 0x3d7   :  { %v1216_v11 = vmul.f32 1.442695, %v1206_v29 }
 0x3da   :  { %v1191_v43 = vpop.f32.mrf.mxu2 }
 0x3db   :  { %v2051_v55 = vadd.f32 %v1191_v43, %v1120_v46 }
 0x3dd   :  { %v1207_v44 = vsub.f32 0.0, %v2051_v55 }
 0x3df   :  { %v1218_v50 = vmul.f32 1.442695, %v1207_v44 }
 0x3e2   :  { %v1194_v42 = vpop.f32.mrf.mxu2 }
 0x3e3   :  { %v2049_v57 = vadd.f32 %v1194_v42, %v1125_v49 }
 0x3e5   :  { %v1208_v62 = vsub.f32 0.0, %v2049_v57 }
 0x3e7   :  { %v1220_v6 = vmul.f32 1.442695, %v1208_v62 }
 0x3ea   :  { %v1196_v51 = vpop.f32.mrf.mxu2 }
 0x3eb   :  { %v2047_v30 = vadd.f32 %v1196_v51, %v1130_v59 }
 0x3ed   :  { %v1209_v58 = vsub.f32 0.0, %v2047_v30 }
 0x3ef   :  { %v1222_v40 = vmul.f32 1.442695, %v1209_v58  ;;  %v1269_v58 = vpop.permute.xlu0 %1268 }
 0x3f2   :  { %v1199_v0 = vpop.f32.mrf.mxu2 }
 0x3f3   :  { %v1200_v20 = vadd.f32 %v1199_v0, %v1135_v48 }
 0x3f5   :  { %v1210_v60 = vsub.f32 0.0, %v1200_v20 }
 0x3f7   :  { %v1224_v27 = vmul.f32 1.442695, %v1210_v60 }
 0x3f9   :  { %1580 = vpow2.f32 %v1224_v27  ;;  %v1259_v27 = vpop.permute.xlu2 %1258 }
 0x3fa   :  { %v1201_v5 = vpop.f32.mrf.mxu2  ;;  %1582 = vpow2.f32 %v1222_v40 }
 0x3fb   :  { %v1202_v53 = vadd.f32 %v1201_v5, %v1140_v47  ;;  %1584 = vpow2.f32 %v1220_v6  ;;  %v1274_v6 = vpop.permute.xlu1 %1273 }
 0x3fc   :  { %1586 = vpow2.f32 %v1218_v50 }
 0x3fd   :  { %v1211_v9 = vsub.f32 0.0, %v1202_v53 }
 0x3ff   :  { %v1226_v12 = vmul.f32 1.442695, %v1211_v9  ;;  %v1581_v45 = vpop.eup %1580 }
 0x400   :  { %v1583_v14 = vpop.eup %1582  ;;  %v1234_v52 = vadd.f32 1.0, %v1581_v45 }
 0x401   :  { %1588 = vpow2.f32 %v1226_v12  ;;  %v1585_v18 = vpop.eup %1584  ;;  %v1233_v19 = vadd.f32 1.0, %v1583_v14 }
 0x402   :  { %1590 = vpow2.f32 %v1216_v11  ;;  %v1587_v1 = vpop.eup %1586  ;;  %v1232_v22 = vadd.f32 1.0, %v1585_v18 }
 0x403   :  { %1592 = vpow2.f32 %v1214_v13  ;;  %v1231_v24 = vadd.f32 1.0, %v1587_v1 }
 0x404   :  { %1594 = vpow2.f32 %v1212_v17 }
 0x405   :  { %1596 = vrcp.f32 %v1234_v52 }
 0x406   :  { %1598 = vrcp.f32 %v1233_v19 }
 0x407   :  { %v1589_v15 = vpop.eup %1588 }
 0x408   :  { %v1235_v21 = vadd.f32 1.0, %v1589_v15  ;;  %v1591_v23 = vpop.eup %1590 }
 0x409   :  { %v1593_v25 = vpop.eup %1592  ;;  %v1230_v26 = vadd.f32 1.0, %v1591_v23 }
 0x40a   :  { %1600 = vrcp.f32 %v1235_v21  ;;  %v1595_v28 = vpop.eup %1594  ;;  %v1229_v34 = vadd.f32 1.0, %v1593_v25 }
 0x40b   :  { %1602 = vrcp.f32 %v1232_v22  ;;  %v1597_v31 = vpop.eup %1596  ;;  %v1228_v38 = vadd.f32 1.0, %v1595_v28 }
 0x40c   :  { %1604 = vrcp.f32 %v1231_v24  ;;  %v1599_v33 = vpop.eup %1598  ;;  %v1250_v32 = vmul.f32 %v1597_v31, %v1200_v20  ;;  %v1513_v20 = vld [vmem:[%s2109_s1 + $0x78] sm:$0xff]  ;;  %v1514_v31 = vld [vmem:[%s2109_s1 + $0x80] sm:$0xff] }
 0x40d   :  { %1606 = vrcp.f32 %v1230_v26  ;;  %v1249_v7 = vmul.f32 %v1599_v33, %v2047_v30 }
 0x40e   :  { %1608 = vrcp.f32 %v1229_v34  ;;  %v1632_v34 = vld [vmem:[%s2108_s0 + $0x20] sm:$0x1] }
 0x40f   :  { %1610 = vrcp.f32 %v1228_v38  ;;  %v35_v33 = vmul.f32 0.5, %v1632_v34 }
 0x410   :  { %v1601_v36 = vpop.eup %1600 }
 0x411   :  { %v1251_v39 = vmul.f32 %v1601_v36, %v1202_v53  ;;  %v1603_v41 = vpop.eup %1602  ;;  %v37_v38 = vmul.f32 %v35_v33, %v35_v33 }
 0x412   :  { %v1605_v37 = vpop.eup %1604  ;;  %v1248_v43 = vmul.f32 %v1603_v41, %v2049_v57  ;;  %v1512_v57 = vld [vmem:[%s2109_s1 + $0x70] sm:$0xff] }
 0x413   :  { %v1255_v54 = vpack.c.bf16 %v1251_v39, %v1250_v32  ;;  %v1607_v42 = vpop.eup %1606  ;;  %v1247_v47 = vmul.f32 %v1605_v37, %v2051_v55  ;;  %v36_v39 = vmul.f32 %v35_v33, %v1691_v16  ;;  %v17_v16 = vld [vmem:[%s2108_s0 + $0x10] sm:$0xff] }
 0x414   :  { %v1254_v48 = vpack.c.bf16 %v1249_v7, %v1248_v43  ;;  %v1609_v49 = vpop.eup %1608  ;;  %v1246_v51 = vmul.f32 %v1607_v42, %v2054_v61  ;;  %v1264_v61 = vpop.permute.xlu0 %1263  ;;  %v1633_v42 = vld [vmem:[%s2108_s0] sm:$0xff] }
 0x415   :  { %1296 = vmatpush.bf16.msrb.mxu0 %v1255_v54  ;;  %v1611_v56 = vpop.eup %1610  ;;  %v1245_v59 = vmul.f32 %v1609_v49, %v2058_v3  ;;  %v1372_v7 = vperm.slane %v36_v39, 0  ;;  %v1340_v54 = vpop.permute.xlu1 %1339 }
 0x416   :  { %v1253_v0 = vpack.c.bf16 %v1247_v47, %v1246_v51  ;;  %v1244_v30 = vmul.f32 %v1611_v56, %v2060_v35 }
 0x418   :  { %v1252_v46 = vpack.c.bf16 %v1245_v59, %v1244_v30  ;;  %v1345_v59 = vpop.permute.xlu2 %1344  ;;  %v20_v30 = vld [vmem:[%s2108_s0 + $0x21] sm:$0x1] }
 0x419   :  { %1297 = vmatpush.bf16.msrb.mxu0 %v1254_v48 }
 0x41d   :  { %1298 = vmatpush.bf16.msrb.mxu0 %v1253_v0 }
 0x421   :  { %1299 = vmatpush.bf16.msrb.mxu0 %v1252_v46  ;;  %v1634_v46 = vld [vmem:[%s2108_s0 + $0x8] sm:$0xff] }
 0x424   :  { %1491 = vmatmul.msk.bf16.vlgmr.msrb.gmra.mxu0 %vm1162_vm3, %v1512_v57 }
 0x434   :  { %1492 = vmatmul.msk.bf16.gmra.mxu0 %vm1162_vm3, %v1513_v20 }
 0x4a1   :  { %v1301_v55 = vpop.f32.mrf.mxu0 }
 0x4a2   :  { %v1302_v44 = vadd.f32 %v1301_v55, %v1259_v27 }
 0x4a4   :  { %v1311_v35 = vsub.f32 0.0, %v1302_v44 }
 0x4a6   :  { %v1315_v50 = vmul.f32 1.442695, %v1311_v35 }
 0x4a9   :  { %v1303_v60 = vpop.f32.mrf.mxu0 }
 0x4aa   :  { %v1304_v62 = vadd.f32 %v1303_v60, %v1264_v61 }
 0x4ac   :  { %v1312_v2 = vsub.f32 0.0, %v1304_v62 }
 0x4ae   :  { %v1317_v29 = vmul.f32 1.442695, %v1312_v2 }
 0x4b1   :  { %v1306_v63 = vpop.f32.mrf.mxu0 }
 0x4b2   :  { %v1307_v40 = vadd.f32 %v1306_v63, %v1269_v58 }
 0x4b4   :  { %v1313_v3 = vsub.f32 0.0, %v1307_v40 }
 0x4b6   :  { %v1319_v5 = vmul.f32 1.442695, %v1313_v3 }
 0x4b8   :  { %1612 = vpow2.f32 %v1319_v5 }
 0x4b9   :  { %v1308_v53 = vpop.f32.mrf.mxu0  ;;  %1614 = vpow2.f32 %v1317_v29 }
 0x4ba   :  { %v1309_v8 = vadd.f32 %v1308_v53, %v1274_v6  ;;  %1616 = vpow2.f32 %v1315_v50 }
 0x4bc   :  { %v1314_v9 = vsub.f32 0.0, %v1309_v8 }
 0x4be   :  { %v1321_v10 = vmul.f32 1.442695, %v1314_v9  ;;  %v1613_v11 = vpop.eup %1612 }
 0x4bf   :  { %v1615_v12 = vpop.eup %1614  ;;  %v1325_v45 = vadd.f32 1.0, %v1613_v11 }
 0x4c0   :  { %1618 = vpow2.f32 %v1321_v10  ;;  %v1617_v13 = vpop.eup %1616  ;;  %v1324_v14 = vadd.f32 1.0, %v1615_v12 }
 0x4c1   :  { %v1323_v52 = vadd.f32 1.0, %v1617_v13  ;;  %1620 = vrcp.f32 %v1325_v45 }
 0x4c2   :  { %1622 = vrcp.f32 %v1324_v14 }
 0x4c6   :  { %v1619_v17 = vpop.eup %1618 }
 0x4c7   :  { %v1326_v18 = vadd.f32 1.0, %v1619_v17  ;;  %v1621_v19 = vpop.eup %1620 }
 0x4c8   :  { %v1623_v1 = vpop.eup %1622  ;;  %v1333_v22 = vmul.f32 %v1621_v19, %v1307_v40 }
 0x4c9   :  { %1624 = vrcp.f32 %v1326_v18  ;;  %v1332_v24 = vmul.f32 %v1623_v1, %v1304_v62 }
 0x4ca   :  { %1626 = vrcp.f32 %v1323_v52 }
 0x4cb   :  { %1628 = vrcp.f32 %v1671_v4 }
 0x4cc   :  { %1630 = vrcp.f32 %v37_v38 }
 0x4cf   :  { %v1625_v15 = vpop.eup %1624 }
 0x4d0   :  { %v1334_v21 = vmul.f32 %v1625_v15, %v1309_v8  ;;  %v1627_v23 = vpop.eup %1626 }
 0x4d1   :  { %v1331_v26 = vmul.f32 %v1627_v23, %v1302_v44  ;;  %v1629_v36 = vpop.eup %1628 }
 0x4d2   :  { %v1336_v25 = vpack.c.bf16 %v1334_v21, %v1333_v22  ;;  %v34_v32 = vmul.f32 0.25, %v1629_v36  ;;  %v1631_v49 = vpop.eup %1630 }
 0x4d3   :  { %v1335_v28 = vpack.c.bf16 %v1332_v24, %v1331_v26  ;;  %v39_v56 = vmul.f32 %v1631_v49, %v1671_v4  ;;  %v18_v4 = vld [vmem:[%s2108_s0 + $0x18] sm:$0xff] }
 0x4d4   :  { %1361 = vmatpush.bf16.msra.mxu1 %v1336_v25  ;;  %v1369_v41 = vperm.slane %v34_v32, 0 }
 0x4d5   :  { %v1377_v58 = vmul.f32 %v39_v56, %v20_v30 }
 0x4d6   :  { %v1370_v47 = vmul.f32 %v1633_v42, %v1369_v41  ;;  %v1371_v57 = vmul.f32 %v1634_v46, %v1369_v41 }
 0x4d7   :  { %v1382_v63 = vperm.slane %v1377_v58, 0 }
 0x4d8   :  { %1362 = vmatpush.bf16.msra.mxu1 %v1335_v28 }
 0x4db   :  { %1497 = vmatmul.msk.bf16.vlgmr.msra.gmra.mxu1 %vm776_vm0, %v1514_v31 }
 0x558   :  { %v1364_v37 = vpop.f32.mrf.mxu1 }
 0x559   :  { %v1365_v43 = vadd.f32 %v1364_v37, %v1340_v54 }
 0x55b   :  { %v1373_v48 = vmul.f32 %v1372_v7, %v1365_v43 }
 0x55d   :  { %v1375_v51 = vadd.f32 %v1373_v48, %v1370_v47 }
 0x55f   :  { %v1378_v60 = vsub.f32 %v1375_v51, %v17_v16 }
 0x560   :  { %v1366_v0 = vpop.f32.mrf.mxu1 }
 0x561   :  { %v1367_v20 = vadd.f32 %v1366_v0, %v1345_v59  ;;  %v1380_v27 = vmul.f32 %v1378_v60, %v1378_v60 }
 0x563   :  { %v1374_v55 = vmul.f32 %v1372_v7, %v1367_v20  ;;  %v1383_v40 = vmul.f32 %v1382_v63, %v1380_v27 }
 0x565   :  { %v1376_v61 = vadd.f32 %v1374_v55, %v1371_v57 }
 0x567   :  { %v1379_v62 = vsub.f32 %v1376_v61, %v18_v4 }
 0x569   :  { %v1381_v44 = vmul.f32 %v1379_v62, %v1379_v62 }
 0x56b   :  { %v1384_v2 = vmul.f32 %v1382_v63, %v1381_v44 }
 0x56d   :  { %v1385_v3 = vadd.f32 %v1384_v2, %v1383_v40 }
 0x56f   :  { %1386 = vadd.xlane.f32.xlu0 %v1385_v3 }
 0x5e2   :  { %v1387_v35 = vpop.xlane.xlu0 %1386 }
 0x5e3   :  { %v1388_v5 = vrot.slane %v1387_v35, 4 }
 0x5e5   :  { %v1389_v29 = vadd.f32 %v1388_v5, %v1387_v35 }
 0x5e7   :  { %v1390_v6 = vrot.slane %v1389_v29, 2 }
 0x5e9   :  { %v1391_v53 = vadd.f32 %v1390_v6, %v1389_v29 }
 0x5eb   :  { %v1392_v50 = vrot.slane %v1391_v53, 1 }
 0x5ed   :  { %v1393_v8 = vadd.f32 %v1392_v50, %v1391_v53 }
 0x5ef   :  { %1516 = vpush %v1393_v8 }
 0x620   :  { %s1517_s25 = spop %1516 }
 0x621   :  { %v1395_v9 = vstv %s1517_s25 }
 0x622   :  { %1396 = vst [vmem:[%s2110_s3] sm:$0xff] %v1395_v9 }

</bundles_post_ra>
